<compile_context>
chip_gen: v6e
topology: v6e:2x2x1
jax: 0.10.0
libtpu: 0.0.40
codegen_flags: <defaults>
</compile_context>

<pallas_src>
import functools

import jax
import jax.numpy as jnp
from jax.experimental import pallas as pl
from jax.experimental.pallas import tpu as pltpu

EPS = 1e-5        # CLIP LayerNorm eps
NORM_FLOOR = 1e-12  # guard for L2-normalize of (near-)zero rows


# ----------------- Kernel A: fused image encoder ----------------------------
def _image_encoder_kernel(x_ref, wp_ref, bp_ref, pos_ref, g_ref, b_ref,
                          wv_ref, o_ref, *, n_patch):
    rows, _ = x_ref.shape                 # rows = tb * n_patch  (static)
    tb = rows // n_patch
    width = wp_ref.shape[1]

    # patch-embed matmul on the MXU (bf16 operands, f32 accumulation)
    emb = jnp.dot(x_ref[...].astype(jnp.bfloat16), wp_ref[...],
                  preferred_element_type=jnp.float32)          # (rows, width)
    emb = emb.reshape(tb, n_patch, width) + bp_ref[...] + pos_ref[...]

    # LayerNorm (f32)
    mu = jnp.mean(emb, axis=-1, keepdims=True)
    var = jnp.mean((emb - mu) ** 2, axis=-1, keepdims=True)
    xn = (emb - mu) * jax.lax.rsqrt(var + EPS) * g_ref[...] + b_ref[...]

    # mean-pool over patch tokens, then vision projection
    pooled = jnp.mean(xn, axis=1)                              # (tb, width)
    o_ref[...] = jnp.dot(pooled.astype(jnp.bfloat16), wv_ref[...],
                         preferred_element_type=jnp.float32)   # (tb, embed)


def image_encoder(patches, n_patch, params):
    rows, kpad = patches.shape
    b = rows // n_patch
    w_patch = params["w_patch"].astype(jnp.bfloat16)
    w_vproj = params["w_vproj"].astype(jnp.bfloat16)
    width = w_patch.shape[1]
    embed = w_vproj.shape[1]

    # batch tile: keep the output block sublane-aligned (tb % 8 == 0 or tb == b)
    tb = 8 if b % 8 == 0 else b
    grid = (b // tb,)

    kern = functools.partial(_image_encoder_kernel, n_patch=n_patch)
    return pl.pallas_call(
        kern,
        grid=grid,
        in_specs=[
            pl.BlockSpec((tb * n_patch, kpad), lambda i: (i, 0)),   # activations
            pl.BlockSpec((kpad, width), lambda i: (0, 0)),          # w_patch (resident)
            pl.BlockSpec((1, 1, width), lambda i: (0, 0, 0)),       # b_patch
            pl.BlockSpec((1, n_patch, width), lambda i: (0, 0, 0)), # pos_v
            pl.BlockSpec((1, 1, width), lambda i: (0, 0, 0)),       # ln gamma
            pl.BlockSpec((1, 1, width), lambda i: (0, 0, 0)),       # ln beta
            pl.BlockSpec((width, embed), lambda i: (0, 0)),         # w_vproj (resident)
        ],
        out_specs=pl.BlockSpec((tb, embed), lambda i: (i, 0)),
        out_shape=jax.ShapeDtypeStruct((b, embed), jnp.float32),
        compiler_params=pltpu.CompilerParams(
            dimension_semantics=("parallel",),
            vmem_limit_bytes=32 * 1024 * 1024,   # fits v5e/v6e/v7x scoped VMEM
        ),
    )(patches, w_patch, params["b_patch"], params["pos_v"],
      params["g_v"], params["b_v"], w_vproj)


# --------- Kernel B: fused text head + normalize + cosine sim + softmax ------
def _text_probs_kernel(scale_ref, t_ref, gt_ref, bt_ref, wt_ref, img_ref,
                       o_ref, *, n_cls):
    scale = scale_ref[0, 0]                                    # scalar from SMEM

    # text LayerNorm + projection (padded class rows are all-zero)
    t = t_ref[...]                                             # (C_pad, width_t)
    mu = jnp.mean(t, axis=-1, keepdims=True)
    var = jnp.mean((t - mu) ** 2, axis=-1, keepdims=True)
    tn = (t - mu) * jax.lax.rsqrt(var + EPS) * gt_ref[...] + bt_ref[...]
    txt = jnp.dot(tn.astype(jnp.bfloat16), wt_ref[...],
                  preferred_element_type=jnp.float32)          # (C_pad, embed)

    # L2 normalize both feature sets (floor guards zero / padded rows)
    img = img_ref[...]                                         # (B, embed)
    img = img * jax.lax.rsqrt(
        jnp.maximum(jnp.sum(img * img, axis=-1, keepdims=True), NORM_FLOOR))
    txt = txt * jax.lax.rsqrt(
        jnp.maximum(jnp.sum(txt * txt, axis=-1, keepdims=True), NORM_FLOOR))

    # cosine-similarity matmul: contract last dims directly (no transpose)
    sim = jax.lax.dot_general(
        img.astype(jnp.bfloat16), txt.astype(jnp.bfloat16),
        dimension_numbers=(((1,), (1,)), ((), ())),
        preferred_element_type=jnp.float32)                    # (B, C_pad)
    logits = scale * sim

    # mask padded class columns, then softmax
    col = jax.lax.broadcasted_iota(jnp.int32, logits.shape, 1)
    logits = jnp.where(col < n_cls, logits, -jnp.inf)
    m = jnp.max(logits, axis=-1, keepdims=True)
    e = jnp.exp(logits - m)
    denom = jnp.sum(e, axis=-1, keepdims=True)
    o_ref[...] = e * pl.reciprocal(denom, approx=True)


def text_probs(scale, t_eot, img_feat, params, n_cls):
    c_pad, width_t = t_eot.shape
    b, embed = img_feat.shape
    w_tproj = params["w_tproj"].astype(jnp.bfloat16)

    kern = functools.partial(_text_probs_kernel, n_cls=n_cls)
    return pl.pallas_call(
        kern,
        grid=(1,),
        in_specs=[
            pl.BlockSpec(memory_space=pltpu.MemorySpace.SMEM),   # logit scale
            pl.BlockSpec((c_pad, width_t), lambda i: (0, 0)),    # t_eot (padded)
            pl.BlockSpec((1, width_t), lambda i: (0, 0)),        # ln gamma
            pl.BlockSpec((1, width_t), lambda i: (0, 0)),        # ln beta
            pl.BlockSpec((width_t, embed), lambda i: (0, 0)),    # w_tproj
            pl.BlockSpec((b, embed), lambda i: (0, 0)),          # img_feat
        ],
        out_specs=pl.BlockSpec((b, c_pad), lambda i: (0, 0)),
        out_shape=jax.ShapeDtypeStruct((b, c_pad), jnp.float32),
        compiler_params=pltpu.CompilerParams(
            dimension_semantics=("arbitrary",),
            vmem_limit_bytes=32 * 1024 * 1024,
        ),
    )(scale, t_eot, params["g_t"], params["b_t"], w_tproj, img_feat)


# --------------------------- forward (glue + kernels) ------------------------
def domain_incremental_clip_forward(image, text_tokens, params, patch_size):
    B, C_img, H, W = image.shape
    P = patch_size
    nph, npw = H // P, W // P
    n_patch = nph * npw
    patch_dim = C_img * P * P

    # ---- encode_image (simplified ViT stem) ----
    # TODO(synk): at production scale accept NHWC input upstream so this full
    # HBM transpose becomes a pure reshape.
    patches = image.reshape(B, C_img, nph, P, npw, P)
    patches = patches.transpose(0, 2, 4, 1, 3, 5).reshape(B * n_patch, patch_dim)
    # pad contraction dim to match the MXU-aligned (padded-at-init) w_patch
    kpad = params["w_patch"].shape[0]
    if kpad != patch_dim:
        patches = jnp.pad(patches, ((0, 0), (0, kpad - patch_dim)))

    img_feat = image_encoder(patches, n_patch, params)          # (B, embed) f32

    # ---- encode_text (simplified): gather only the EOT token embedding ----
    n_cls = text_tokens.shape[0]
    eot_idx = jnp.argmax(text_tokens, axis=-1)                  # CLIP: feature at argmax token
    eot_tok = text_tokens[jnp.arange(n_cls), eot_idx]
    t_eot = params["tok_emb"][eot_tok] + params["pos_t"][eot_idx]   # (C, width_t)

    # pad classes to a lane-dense multiple of 128 (masked to -inf in-kernel)
    c_pad = ((n_cls + 127) // 128) * 128
    t_eot = jnp.pad(t_eot, ((0, c_pad - n_cls), (0, 0)))

    # PyTorch CLIP stores logit_scale as a log value and applies .exp()
    scale = jnp.exp(params["log_logit_scale"]).reshape(1, 1).astype(jnp.float32)

    probs_padded = text_probs(scale, t_eot, img_feat, params, n_cls)  # (B, c_pad)
    return probs_padded[:, :n_cls]


forward = jax.jit(domain_incremental_clip_forward, static_argnums=(3,))


if __name__ == "__main__":
    key = jax.random.PRNGKey(0)
    B, C_img, H, W, P = 16, 3, 32, 32, 8
    n_patch = (H // P) * (W // P)          # 16
    patch_dim = C_img * P * P              # 192
    kpad = ((patch_dim + 127) // 128) * 128  # 256 (MXU/lane aligned K)
    width = 128                            # vision width
    width_t = 128                          # text width
    embed = 128                            # joint embedding dim
    n_cls, ctx_len, vocab = 4, 8, 64

    keys = jax.random.split(key, 8)
    image = jax.random.normal(keys[0], (B, C_img, H, W), jnp.float32)
    text_tokens = jax.random.randint(keys[1], (n_cls, ctx_len), 1, vocab)  # tokenize() stand-in

    w_patch_raw = 0.02 * jax.random.normal(keys[2], (patch_dim, width), jnp.float32)
    params = dict(
        # w_patch K-dim padded to 256 at init (MXU-friendly; extra rows are zero)
        w_patch=jnp.pad(w_patch_raw, ((0, kpad - patch_dim), (0, 0))),
        b_patch=jnp.zeros((1, 1, width), jnp.float32),
        pos_v=0.02 * jax.random.normal(keys[3], (1, n_patch, width), jnp.float32),
        g_v=jnp.ones((1, 1, width), jnp.float32),
        b_v=jnp.zeros((1, 1, width), jnp.float32),
        w_vproj=0.02 * jax.random.normal(keys[4], (width, embed), jnp.float32),
        tok_emb=0.02 * jax.random.normal(keys[5], (vocab, width_t), jnp.float32),
        pos_t=0.02 * jax.random.normal(keys[6], (ctx_len, width_t), jnp.float32),
        g_t=jnp.ones((1, width_t), jnp.float32),
        b_t=jnp.zeros((1, width_t), jnp.float32),
        w_tproj=0.02 * jax.random.normal(keys[7], (width_t, embed), jnp.float32),
        log_logit_scale=jnp.log(jnp.asarray(1.0 / 0.07, jnp.float32)),
    )

    probs = forward(image, text_tokens, params, P)
    probs = jax.block_until_ready(probs)

    assert probs.shape == (B, n_cls), probs.shape
    assert bool(jnp.all(jnp.isfinite(probs)))
    # approx reciprocal in the softmax denominator -> sums are ~1 within ~1e-3
    assert bool(jnp.allclose(jnp.sum(probs, axis=-1), 1.0, atol=5e-3))
    print("KERNEL_OK")
</pallas_src>

<mosaic_0001>
module attributes {stable_mosaic.version = 11 : i64} {
  func.func @_image_encoder_kernel(%arg0: i32, %arg1: memref<128x256xf32, #tpu.memory_space<vmem>>, %arg2: memref<256x128xbf16, #tpu.memory_space<vmem>>, %arg3: memref<1x1x128xf32, #tpu.memory_space<vmem>>, %arg4: memref<1x16x128xf32, #tpu.memory_space<vmem>>, %arg5: memref<1x1x128xf32, #tpu.memory_space<vmem>>, %arg6: memref<1x1x128xf32, #tpu.memory_space<vmem>>, %arg7: memref<128x128xbf16, #tpu.memory_space<vmem>>, %arg8: memref<8x128xf32, #tpu.memory_space<vmem>>) attributes {dimension_semantics = [#tpu.dimension_semantics<parallel>], iteration_bounds = array<i64: 2>, scalar_prefetch = 0 : i64, scratch_operands = 0 : i64, tpu.core_type = #tpu.core_type<tc>, window_params = [{transform_indices = @transform_0, window_bounds = array<i64: 128, 256>}, {pipeline_mode = #tpu.pipeline_mode<synchronous>, transform_indices = @transform_1, window_bounds = array<i64: 256, 128>}, {pipeline_mode = #tpu.pipeline_mode<synchronous>, transform_indices = @transform_2, window_bounds = array<i64: 1, 1, 128>}, {pipeline_mode = #tpu.pipeline_mode<synchronous>, transform_indices = @transform_3, window_bounds = array<i64: 1, 16, 128>}, {pipeline_mode = #tpu.pipeline_mode<synchronous>, transform_indices = @transform_4, window_bounds = array<i64: 1, 1, 128>}, {pipeline_mode = #tpu.pipeline_mode<synchronous>, transform_indices = @transform_5, window_bounds = array<i64: 1, 1, 128>}, {pipeline_mode = #tpu.pipeline_mode<synchronous>, transform_indices = @transform_6, window_bounds = array<i64: 128, 128>}, {transform_indices = @transform_7, window_bounds = array<i64: 8, 128>}]} {
    %c0 = arith.constant 0 : index
    %c0_0 = arith.constant 0 : index
    %0 = vector.load %arg1[%c0, %c0_0] : memref<128x256xf32, #tpu.memory_space<vmem>>, vector<128x256xf32>
    %1 = arith.truncf %0 : vector<128x256xf32> to vector<128x256xbf16>
    %c0_1 = arith.constant 0 : index
    %c0_2 = arith.constant 0 : index
    %2 = vector.load %arg2[%c0_1, %c0_2] : memref<256x128xbf16, #tpu.memory_space<vmem>>, vector<256x128xbf16>
    %cst = arith.constant dense<0.000000e+00> : vector<128x128xf32>
    %3 = tpu.matmul %1, %2, %cst {dimension_numbers = #tpu.dot_dimension_numbers<[1], [0], [0], [1], [0, 0, 1, 1], [], []>} : vector<128x256xbf16>, vector<256x128xbf16>, vector<128x128xf32> -> vector<128x128xf32>
    %4 = vector.shape_cast %3 : vector<128x128xf32> to vector<8x16x128xf32>
    %c0_3 = arith.constant 0 : index
    %c0_4 = arith.constant 0 : index
    %c0_5 = arith.constant 0 : index
    %5 = vector.load %arg3[%c0_3, %c0_4, %c0_5] : memref<1x1x128xf32, #tpu.memory_space<vmem>>, vector<1x1x128xf32>
    %6 = vector.broadcast %5 : vector<1x1x128xf32> to vector<8x16x128xf32>
    %7 = arith.addf %4, %6 : vector<8x16x128xf32>
    %c0_6 = arith.constant 0 : index
    %c0_7 = arith.constant 0 : index
    %c0_8 = arith.constant 0 : index
    %8 = vector.load %arg4[%c0_6, %c0_7, %c0_8] : memref<1x16x128xf32, #tpu.memory_space<vmem>>, vector<1x16x128xf32>
    %9 = vector.broadcast %8 : vector<1x16x128xf32> to vector<8x16x128xf32>
    %10 = arith.addf %7, %9 : vector<8x16x128xf32>
    %cst_9 = arith.constant dense<0.000000e+00> : vector<8x16xf32>
    %11 = vector.multi_reduction <add>, %10, %cst_9 [2] : vector<8x16x128xf32> to vector<8x16xf32>
    %12 = vector.shape_cast %11 : vector<8x16xf32> to vector<8x16x1xf32>
    %cst_10 = arith.constant 1.280000e+02 : f32
    %13 = vector.broadcast %cst_10 : f32 to vector<8x16x1xf32>
    %14 = arith.divf %12, %13 : vector<8x16x1xf32>
    %15 = vector.broadcast %14 : vector<8x16x1xf32> to vector<8x16x128xf32>
    %16 = arith.subf %10, %15 : vector<8x16x128xf32>
    %17 = arith.mulf %16, %16 : vector<8x16x128xf32>
    %cst_11 = arith.constant dense<0.000000e+00> : vector<8x16xf32>
    %18 = vector.multi_reduction <add>, %17, %cst_11 [2] : vector<8x16x128xf32> to vector<8x16xf32>
    %19 = vector.shape_cast %18 : vector<8x16xf32> to vector<8x16x1xf32>
    %cst_12 = arith.constant 1.280000e+02 : f32
    %20 = vector.broadcast %cst_12 : f32 to vector<8x16x1xf32>
    %21 = arith.divf %19, %20 : vector<8x16x1xf32>
    %22 = vector.broadcast %14 : vector<8x16x1xf32> to vector<8x16x128xf32>
    %23 = arith.subf %10, %22 : vector<8x16x128xf32>
    %cst_13 = arith.constant 9.99999974E-6 : f32
    %24 = vector.broadcast %cst_13 : f32 to vector<8x16x1xf32>
    %25 = arith.addf %21, %24 : vector<8x16x1xf32>
    %26 = math.rsqrt %25 : vector<8x16x1xf32>
    %27 = vector.broadcast %26 : vector<8x16x1xf32> to vector<8x16x128xf32>
    %28 = arith.mulf %23, %27 : vector<8x16x128xf32>
    %c0_14 = arith.constant 0 : index
    %c0_15 = arith.constant 0 : index
    %c0_16 = arith.constant 0 : index
    %29 = vector.load %arg5[%c0_14, %c0_15, %c0_16] : memref<1x1x128xf32, #tpu.memory_space<vmem>>, vector<1x1x128xf32>
    %30 = vector.broadcast %29 : vector<1x1x128xf32> to vector<8x16x128xf32>
    %31 = arith.mulf %28, %30 : vector<8x16x128xf32>
    %c0_17 = arith.constant 0 : index
    %c0_18 = arith.constant 0 : index
    %c0_19 = arith.constant 0 : index
    %32 = vector.load %arg6[%c0_17, %c0_18, %c0_19] : memref<1x1x128xf32, #tpu.memory_space<vmem>>, vector<1x1x128xf32>
    %33 = vector.broadcast %32 : vector<1x1x128xf32> to vector<8x16x128xf32>
    %34 = arith.addf %31, %33 : vector<8x16x128xf32>
    %cst_20 = arith.constant dense<0.000000e+00> : vector<8x128xf32>
    %35 = vector.multi_reduction <add>, %34, %cst_20 [1] : vector<8x16x128xf32> to vector<8x128xf32>
    %cst_21 = arith.constant 1.600000e+01 : f32
    %36 = vector.broadcast %cst_21 : f32 to vector<8x128xf32>
    %37 = arith.divf %35, %36 : vector<8x128xf32>
    %38 = arith.truncf %37 : vector<8x128xf32> to vector<8x128xbf16>
    %c0_22 = arith.constant 0 : index
    %c0_23 = arith.constant 0 : index
    %39 = vector.load %arg7[%c0_22, %c0_23] : memref<128x128xbf16, #tpu.memory_space<vmem>>, vector<128x128xbf16>
    %cst_24 = arith.constant dense<0.000000e+00> : vector<8x128xf32>
    %40 = tpu.matmul %38, %39, %cst_24 {dimension_numbers = #tpu.dot_dimension_numbers<[1], [0], [0], [1], [0, 0, 1, 1], [], []>} : vector<8x128xbf16>, vector<128x128xbf16>, vector<8x128xf32> -> vector<8x128xf32>
    %c0_25 = arith.constant 0 : index
    %c0_26 = arith.constant 0 : index
    %41 = vector.load %arg8[%c0_25, %c0_26] : memref<8x128xf32, #tpu.memory_space<vmem>>, vector<8x128xf32>
    tpu.vector_store %arg8[%c0_25, %c0_26], %40 {strides = array<i32>} : memref<8x128xf32, #tpu.memory_space<vmem>>, vector<8x128xf32>,
    return
  }
  func.func @transform_0(%arg0: i32) -> (i32, i32) {
    %c0_i32 = arith.constant 0 : i32
    %c0_i32_0 = arith.constant 0 : i32
    return %arg0, %c0_i32 : i32, i32
  }
  func.func @transform_1(%arg0: i32) -> (i32, i32) {
    %c0_i32 = arith.constant 0 : i32
    %c0_i32_0 = arith.constant 0 : i32
    %c0_i32_1 = arith.constant 0 : i32
    return %c0_i32, %c0_i32_0 : i32, i32
  }
  func.func @transform_2(%arg0: i32) -> (i32, i32, i32) {
    %c0_i32 = arith.constant 0 : i32
    %c0_i32_0 = arith.constant 0 : i32
    %c0_i32_1 = arith.constant 0 : i32
    %c0_i32_2 = arith.constant 0 : i32
    return %c0_i32, %c0_i32_0, %c0_i32_1 : i32, i32, i32
  }
  func.func @transform_3(%arg0: i32) -> (i32, i32, i32) {
    %c0_i32 = arith.constant 0 : i32
    %c0_i32_0 = arith.constant 0 : i32
    %c0_i32_1 = arith.constant 0 : i32
    %c0_i32_2 = arith.constant 0 : i32
    return %c0_i32, %c0_i32_0, %c0_i32_1 : i32, i32, i32
  }
  func.func @transform_4(%arg0: i32) -> (i32, i32, i32) {
    %c0_i32 = arith.constant 0 : i32
    %c0_i32_0 = arith.constant 0 : i32
    %c0_i32_1 = arith.constant 0 : i32
    %c0_i32_2 = arith.constant 0 : i32
    return %c0_i32, %c0_i32_0, %c0_i32_1 : i32, i32, i32
  }
  func.func @transform_5(%arg0: i32) -> (i32, i32, i32) {
    %c0_i32 = arith.constant 0 : i32
    %c0_i32_0 = arith.constant 0 : i32
    %c0_i32_1 = arith.constant 0 : i32
    %c0_i32_2 = arith.constant 0 : i32
    return %c0_i32, %c0_i32_0, %c0_i32_1 : i32, i32, i32
  }
  func.func @transform_6(%arg0: i32) -> (i32, i32) {
    %c0_i32 = arith.constant 0 : i32
    %c0_i32_0 = arith.constant 0 : i32
    %c0_i32_1 = arith.constant 0 : i32
    return %c0_i32, %c0_i32_0 : i32, i32
  }
  func.func @transform_7(%arg0: i32) -> (i32, i32) {
    %c0_i32 = arith.constant 0 : i32
    %c0_i32_0 = arith.constant 0 : i32
    return %arg0, %c0_i32 : i32, i32
  }
}

module attributes {stable_mosaic.version = 11 : i64} {
  func.func @_text_probs_kernel(%arg0: i32, %arg1: memref<1x1xf32, #tpu.memory_space<smem>>, %arg2: memref<128x128xf32, #tpu.memory_space<vmem>>, %arg3: memref<1x128xf32, #tpu.memory_space<vmem>>, %arg4: memref<1x128xf32, #tpu.memory_space<vmem>>, %arg5: memref<128x128xbf16, #tpu.memory_space<vmem>>, %arg6: memref<16x128xf32, #tpu.memory_space<vmem>>, %arg7: memref<16x128xf32, #tpu.memory_space<vmem>>) attributes {dimension_semantics = [#tpu.dimension_semantics<arbitrary>], iteration_bounds = array<i64: 1>, scalar_prefetch = 0 : i64, scratch_operands = 0 : i64, tpu.core_type = #tpu.core_type<tc>, window_params = [{transform_indices = @transform_0, window_bounds = array<i64: 1, 1>}, {pipeline_mode = #tpu.pipeline_mode<synchronous>, transform_indices = @transform_1, window_bounds = array<i64: 128, 128>}, {pipeline_mode = #tpu.pipeline_mode<synchronous>, transform_indices = @transform_2, window_bounds = array<i64: 1, 128>}, {pipeline_mode = #tpu.pipeline_mode<synchronous>, transform_indices = @transform_3, window_bounds = array<i64: 1, 128>}, {pipeline_mode = #tpu.pipeline_mode<synchronous>, transform_indices = @transform_4, window_bounds = array<i64: 128, 128>}, {pipeline_mode = #tpu.pipeline_mode<synchronous>, transform_indices = @transform_5, window_bounds = array<i64: 16, 128>}, {pipeline_mode = #tpu.pipeline_mode<synchronous>, transform_indices = @transform_6, window_bounds = array<i64: 16, 128>}]} {
    %c0 = arith.constant 0 : index
    %c0_0 = arith.constant 0 : index
    %0 = memref.load %arg1[%c0, %c0_0] : memref<1x1xf32, #tpu.memory_space<smem>>
    %c0_1 = arith.constant 0 : index
    %c0_2 = arith.constant 0 : index
    %1 = vector.load %arg2[%c0_1, %c0_2] : memref<128x128xf32, #tpu.memory_space<vmem>>, vector<128x128xf32>
    %cst = arith.constant dense<0.000000e+00> : vector<128xf32>
    %2 = vector.multi_reduction <add>, %1, %cst [1] : vector<128x128xf32> to vector<128xf32>
    %3 = vector.shape_cast %2 : vector<128xf32> to vector<128x1xf32>
    %cst_3 = arith.constant 1.280000e+02 : f32
    %4 = vector.broadcast %cst_3 : f32 to vector<128x1xf32>
    %5 = arith.divf %3, %4 : vector<128x1xf32>
    %6 = vector.broadcast %5 : vector<128x1xf32> to vector<128x128xf32>
    %7 = arith.subf %1, %6 : vector<128x128xf32>
    %8 = arith.mulf %7, %7 : vector<128x128xf32>
    %cst_4 = arith.constant dense<0.000000e+00> : vector<128xf32>
    %9 = vector.multi_reduction <add>, %8, %cst_4 [1] : vector<128x128xf32> to vector<128xf32>
    %10 = vector.shape_cast %9 : vector<128xf32> to vector<128x1xf32>
    %cst_5 = arith.constant 1.280000e+02 : f32
    %11 = vector.broadcast %cst_5 : f32 to vector<128x1xf32>
    %12 = arith.divf %10, %11 : vector<128x1xf32>
    %13 = vector.broadcast %5 : vector<128x1xf32> to vector<128x128xf32>
    %14 = arith.subf %1, %13 : vector<128x128xf32>
    %cst_6 = arith.constant 9.99999974E-6 : f32
    %15 = vector.broadcast %cst_6 : f32 to vector<128x1xf32>
    %16 = arith.addf %12, %15 : vector<128x1xf32>
    %17 = math.rsqrt %16 : vector<128x1xf32>
    %18 = vector.broadcast %17 : vector<128x1xf32> to vector<128x128xf32>
    %19 = arith.mulf %14, %18 : vector<128x128xf32>
    %c0_7 = arith.constant 0 : index
    %c0_8 = arith.constant 0 : index
    %20 = vector.load %arg3[%c0_7, %c0_8] : memref<1x128xf32, #tpu.memory_space<vmem>>, vector<1x128xf32>
    %21 = vector.broadcast %20 : vector<1x128xf32> to vector<128x128xf32>
    %22 = arith.mulf %19, %21 : vector<128x128xf32>
    %c0_9 = arith.constant 0 : index
    %c0_10 = arith.constant 0 : index
    %23 = vector.load %arg4[%c0_9, %c0_10] : memref<1x128xf32, #tpu.memory_space<vmem>>, vector<1x128xf32>
    %24 = vector.broadcast %23 : vector<1x128xf32> to vector<128x128xf32>
    %25 = arith.addf %22, %24 : vector<128x128xf32>
    %26 = arith.truncf %25 : vector<128x128xf32> to vector<128x128xbf16>
    %c0_11 = arith.constant 0 : index
    %c0_12 = arith.constant 0 : index
    %27 = vector.load %arg5[%c0_11, %c0_12] : memref<128x128xbf16, #tpu.memory_space<vmem>>, vector<128x128xbf16>
    %cst_13 = arith.constant dense<0.000000e+00> : vector<128x128xf32>
    %28 = tpu.matmul %26, %27, %cst_13 {dimension_numbers = #tpu.dot_dimension_numbers<[1], [0], [0], [1], [0, 0, 1, 1], [], []>} : vector<128x128xbf16>, vector<128x128xbf16>, vector<128x128xf32> -> vector<128x128xf32>
    %c0_14 = arith.constant 0 : index
    %c0_15 = arith.constant 0 : index
    %29 = vector.load %arg6[%c0_14, %c0_15] : memref<16x128xf32, #tpu.memory_space<vmem>>, vector<16x128xf32>
    %30 = arith.mulf %29, %29 : vector<16x128xf32>
    %cst_16 = arith.constant dense<0.000000e+00> : vector<16xf32>
    %31 = vector.multi_reduction <add>, %30, %cst_16 [1] : vector<16x128xf32> to vector<16xf32>
    %32 = vector.shape_cast %31 : vector<16xf32> to vector<16x1xf32>
    %cst_17 = arith.constant 9.99999996E-13 : f32
    %33 = vector.broadcast %cst_17 : f32 to vector<16x1xf32>
    %34 = arith.maximumf %32, %33 : vector<16x1xf32>
    %35 = math.rsqrt %34 : vector<16x1xf32>
    %36 = vector.broadcast %35 : vector<16x1xf32> to vector<16x128xf32>
    %37 = arith.mulf %29, %36 : vector<16x128xf32>
    %38 = arith.mulf %28, %28 : vector<128x128xf32>
    %cst_18 = arith.constant dense<0.000000e+00> : vector<128xf32>
    %39 = vector.multi_reduction <add>, %38, %cst_18 [1] : vector<128x128xf32> to vector<128xf32>
    %40 = vector.shape_cast %39 : vector<128xf32> to vector<128x1xf32>
    %cst_19 = arith.constant 9.99999996E-13 : f32
    %41 = vector.broadcast %cst_19 : f32 to vector<128x1xf32>
    %42 = arith.maximumf %40, %41 : vector<128x1xf32>
    %43 = math.rsqrt %42 : vector<128x1xf32>
    %44 = vector.broadcast %43 : vector<128x1xf32> to vector<128x128xf32>
    %45 = arith.mulf %28, %44 : vector<128x128xf32>
    %46 = arith.truncf %37 : vector<16x128xf32> to vector<16x128xbf16>
    %47 = arith.truncf %45 : vector<128x128xf32> to vector<128x128xbf16>
    %cst_20 = arith.constant dense<0.000000e+00> : vector<16x128xf32>
    %48 = tpu.matmul %46, %47, %cst_20 {dimension_numbers = #tpu.dot_dimension_numbers<[1], [1], [0], [0], [0, 0, 1, 0], [], []>} : vector<16x128xbf16>, vector<128x128xbf16>, vector<16x128xf32> -> vector<16x128xf32>
    %49 = vector.broadcast %0 : f32 to vector<16x128xf32>
    %50 = arith.mulf %49, %48 : vector<16x128xf32>
    %51 = tpu.iota {dimensions = array<i32: 1>} : vector<16x128xi32>
    %c4_i32 = arith.constant 4 : i32
    %52 = vector.broadcast %c4_i32 : i32 to vector<16x128xi32>
    %53 = arith.cmpi slt, %51, %52 : vector<16x128xi32>
    %cst_21 = arith.constant 0xFF800000 : f32
    %54 = vector.broadcast %cst_21 : f32 to vector<16x128xf32>
    %55 = arith.select %53, %50, %54 : vector<16x128xi1>, vector<16x128xf32>
    %cst_22 = arith.constant dense<0xFF800000> : vector<16xf32>
    %56 = vector.multi_reduction <maximumf>, %55, %cst_22 [1] : vector<16x128xf32> to vector<16xf32>
    %57 = vector.shape_cast %56 : vector<16xf32> to vector<16x1xf32>
    %58 = vector.broadcast %57 : vector<16x1xf32> to vector<16x128xf32>
    %59 = arith.subf %55, %58 : vector<16x128xf32>
    %60 = math.exp %59 : vector<16x128xf32>
    %cst_23 = arith.constant dense<0.000000e+00> : vector<16xf32>
    %61 = vector.multi_reduction <add>, %60, %cst_23 [1] : vector<16x128xf32> to vector<16xf32>
    %62 = vector.shape_cast %61 : vector<16xf32> to vector<16x1xf32>
    %63 = tpu.reciprocal %62 {approx = true} : vector<16x1xf32> -> vector<16x1xf32>
    %64 = vector.broadcast %63 : vector<16x1xf32> to vector<16x128xf32>
    %65 = arith.mulf %60, %64 : vector<16x128xf32>
    %c0_24 = arith.constant 0 : index
    %c0_25 = arith.constant 0 : index
    %66 = vector.load %arg7[%c0_24, %c0_25] : memref<16x128xf32, #tpu.memory_space<vmem>>, vector<16x128xf32>
    tpu.vector_store %arg7[%c0_24, %c0_25], %65 {strides = array<i32>} : memref<16x128xf32, #tpu.memory_space<vmem>>, vector<16x128xf32>,
    return
  }
  func.func @transform_0(%arg0: i32) -> (i32, i32) {
    %c0_i32 = arith.constant 0 : i32
    %c0_i32_0 = arith.constant 0 : i32
    %c0_i32_1 = arith.constant 0 : i32
    return %c0_i32, %c0_i32_0 : i32, i32
  }
  func.func @transform_1(%arg0: i32) -> (i32, i32) {
    %c0_i32 = arith.constant 0 : i32
    %c0_i32_0 = arith.constant 0 : i32
    %c0_i32_1 = arith.constant 0 : i32
    return %c0_i32, %c0_i32_0 : i32, i32
  }
  func.func @transform_2(%arg0: i32) -> (i32, i32) {
    %c0_i32 = arith.constant 0 : i32
    %c0_i32_0 = arith.constant 0 : i32
    %c0_i32_1 = arith.constant 0 : i32
    return %c0_i32, %c0_i32_0 : i32, i32
  }
  func.func @transform_3(%arg0: i32) -> (i32, i32) {
    %c0_i32 = arith.constant 0 : i32
    %c0_i32_0 = arith.constant 0 : i32
    %c0_i32_1 = arith.constant 0 : i32
    return %c0_i32, %c0_i32_0 : i32, i32
  }
  func.func @transform_4(%arg0: i32) -> (i32, i32) {
    %c0_i32 = arith.constant 0 : i32
    %c0_i32_0 = arith.constant 0 : i32
    %c0_i32_1 = arith.constant 0 : i32
    return %c0_i32, %c0_i32_0 : i32, i32
  }
  func.func @transform_5(%arg0: i32) -> (i32, i32) {
    %c0_i32 = arith.constant 0 : i32
    %c0_i32_0 = arith.constant 0 : i32
    %c0_i32_1 = arith.constant 0 : i32
    return %c0_i32, %c0_i32_0 : i32, i32
  }
  func.func @transform_6(%arg0: i32) -> (i32, i32) {
    %c0_i32 = arith.constant 0 : i32
    %c0_i32_0 = arith.constant 0 : i32
    %c0_i32_1 = arith.constant 0 : i32
    return %c0_i32, %c0_i32_0 : i32, i32
  }
}

</mosaic_0001>

<bundles_post_ra>
// kernel: domain_incremental_clip_forward.2
= control target key start
LH: loop header
LB: loop body
LE: loop exit
PB: predicated region body
PF: predicated region fallthrough
CT: control target
= control target key end

     0   :  { %s1331_s24 = smov 0   ;;  %s1692_s0 = inlined_call_operand.vmem [shape: f32[256,256], index: 0, kind: input, shape index: {}]   ;;  %s1693_s1 = inlined_call_operand.vmem [shape: bf16[256,128], index: 1, kind: input, shape index: {}]   ;;  %s1694_s2 = inlined_call_operand.vmem [shape: f32[1,1,128], index: 2, kind: input, shape index: {}]   ;;  %s1695_s3 = inlined_call_operand.vmem [shape: f32[1,16,128], index: 3, kind: input, shape index: {}]   ;;  %s1696_s4 = inlined_call_operand.vmem [shape: f32[1,1,128], index: 4, kind: input, shape index: {}]   ;;  %s1697_s5 = inlined_call_operand.vmem [shape: f32[1,1,128], index: 5, kind: input, shape index: {}]   ;;  %s1698_s6 = inlined_call_operand.vmem [shape: bf16[128,128], index: 6, kind: input, shape index: {}]   ;;  %s1699_s7 = inlined_call_operand.vmem [shape: f32[16,128], index: 7, kind: output, shape index: {}]  }
   0x1 LB: > { %s1337_s25 = sadd.s32 4294967295, %s1287_s24   ;;  %p1087_p0 = scmp.ge.s32.totalorder %s1287_s24, 1  ;;  %s1287_s24 = sphi %s1331_s24, %s17_s24  }
   0x2   : > { %p239_p1 = scmp.lt.s32.totalorder %s1287_s24, 3 }
   0x4   : > { %p240_p2 = pnand %p1087_p0, %p239_p1 }
   0x5   : > { %s1088_s28 = sshll.u32 (!%p240_p2), %s1337_s25, 4  ;;  %p278_p4 = scmp.lt.s32.totalorder (!%p240_p2), %s1337_s25, 1 }
   0x6   : > { %243 = sbr.rel (%p240_p2) target bundleno = 833 (0x341), region = 48  ;;  %p272_p3 = scmp.lt.s32.totalorder (!%p240_p2), %s1088_s28, 31 }
   0xb   : > { %v1225_v0 = vld [vmem:[%s1693_s1 + $0x78] sm:$0xff]   ;;  %v1227_v2 = vld [vmem:[%s1693_s1 + $0x70] sm:$0xff]   ;;  %v1229_v4 = vld [vmem:[%s1693_s1 + $0x68] sm:$0xff]   ;;  %s1701_s28 = smov (!%p272_p3, %s1088_s28), 31  ;;  %vm1290_vm0 = vmmov 0   ;;  %vm925_vm1 = vcmask 1041409  }
   0xc   : > { %v1226_v1 = vld [vmem:[%s1693_s1 + $0x38] sm:$0xff]   ;;  %1122 = vmatprep.subr.bf16.mxu0 %v1225_v0  ;;  %v1228_v3 = vld [vmem:[%s1693_s1 + $0x30] sm:$0xff]   ;;  %v1230_v5 = vld [vmem:[%s1693_s1 + $0x28] sm:$0xff]   ;;  %s1121_s18 = sshll.u32 %s1701_s28, 4  ;;  %vm927_vm2 = vcmask 1042434   ;;  %vm929_vm3 = vcmask 1043459  }
   0xd   : > { %1123 = vmatpush3.bf16.msra.mxu0 %v1226_v1  ;;  %v1231_v6 = vld [vmem:[%s1693_s1 + $0x60] sm:$0xff]   ;;  %v1233_v8 = vld [vmem:[%s1693_s1 + $0x58] sm:$0xff]   ;;  %s1372_s27 = scalar_lea.vmem %s1692_s0, %s1121_s18  ;;  %v1235_v10 = vld [vmem:[%s1693_s1 + $0x50] sm:$0xff]   ;;  %vm931_vm4 = vcmask 1044484   ;;  %vm933_vm5 = vcmask 1045509   ;;  %vm935_vm6 = vcmask 1046534  }
   0xe   : > { %1124 = vmatprep.subr.bf16.mxu0 %v1227_v2  ;;  %v1232_v7 = vld [vmem:[%s1693_s1 + $0x20] sm:$0xff]   ;;  %v1234_v9 = vld [vmem:[%s1693_s1 + $0x18] sm:$0xff]   ;;  %v284_v11 = vld [vmem:[%s1372_s27 + $0x8] sm:$0xff]  ;;  %vm937_vm7 = vcmask 1047559   ;;  %s1703_s25 = smov (!%p278_p4, %s1337_s25), 1 }
   0xf   : > { %v286_v12 = vld [vmem:[%s1372_s27 + $0x18] sm:$0xff]  ;;  %v1236_v14 = vld [vmem:[%s1693_s1 + $0x10] sm:$0xff]   ;;  %v1237_v15 = vld [vmem:[%s1693_s1 + $0x48] sm:$0xff]   ;;  %s1091_s26 = sshll.u32 %s1703_s25, 3 }
  0x10   : > { %v316_v13 = vpack.c.bf16 %v286_v12, %v284_v11  ;;  %v1238_v16 = vld [vmem:[%s1693_s1 + $0x8] sm:$0xff]   ;;  %v1239_v17 = vld [vmem:[%s1693_s1 + $0x40] sm:$0xff]   ;;  %v285_v20 = vld [vmem:[%s1372_s27 + $0x10] sm:$0xff]  ;;  %s281_s28 = scalar_lea.vmem %s1699_s7, %s1091_s26 }
  0x11   : > { %1125 = vmatpush3.bf16.msra.mxu0 %v1228_v3  ;;  %v1240_v18 = vld [vmem:[%s1693_s1] sm:$0xff]   ;;  %v288_v21 = vld [vmem:[%s1372_s27 + $0x28] sm:$0xff]  ;;  %v290_v22 = vld [vmem:[%s1372_s27 + $0x38] sm:$0xff] }
  0x12   : > { %1126 = vmatprep.subr.bf16.mxu0 %v1229_v4  ;;  %491 = vmatprep.mubr.bf16.mxu0 %v316_v13  ;;  %v283_v19 = vld [vmem:[%s1372_s27] sm:$0xff]  ;;  %v318_v24 = vpack.c.bf16 %v290_v22, %v288_v21  ;;  %v289_v26 = vld [vmem:[%s1372_s27 + $0x30] sm:$0xff]  ;;  %v292_v27 = vld [vmem:[%s1372_s27 + $0x48] sm:$0xff] }
  0x13   : > { %v315_v23 = vpack.c.bf16 %v285_v20, %v283_v19  ;;  %v287_v25 = vld [vmem:[%s1372_s27 + $0x20] sm:$0xff]  ;;  %v294_v28 = vld [vmem:[%s1372_s27 + $0x58] sm:$0xff]  ;;  %v293_v32 = vld [vmem:[%s1372_s27 + $0x50] sm:$0xff] }
  0x14   : > { %v317_v29 = vpack.c.bf16 %v289_v26, %v287_v25  ;;  %v320_v30 = vpack.c.bf16 %v294_v28, %v292_v27  ;;  %v291_v31 = vld [vmem:[%s1372_s27 + $0x40] sm:$0xff]  ;;  %v296_v33 = vld [vmem:[%s1372_s27 + $0x68] sm:$0xff]  ;;  %v298_v34 = vld [vmem:[%s1372_s27 + $0x78] sm:$0xff] }
  0x15   : > { %1127 = vmatpush3.bf16.msra.mxu0 %v1230_v5  ;;  %v319_v35 = vpack.c.bf16 %v293_v32, %v291_v31  ;;  %v322_v36 = vpack.c.bf16 %v298_v34, %v296_v33  ;;  %v295_v37 = vld [vmem:[%s1372_s27 + $0x60] sm:$0xff]  ;;  %v297_v38 = vld [vmem:[%s1372_s27 + $0x70] sm:$0xff]  ;;  %v300_v39 = vld [vmem:[%s1372_s27 + $0x88] sm:$0xff] }
  0x16   : > { %1128 = vmatprep.subr.bf16.mxu0 %v1231_v6  ;;  %v302_v40 = vld [vmem:[%s1372_s27 + $0x98] sm:$0xff]  ;;  %v321_v41 = vpack.c.bf16 %v297_v38, %v295_v37  ;;  %v299_v43 = vld [vmem:[%s1372_s27 + $0x80] sm:$0xff]  ;;  %v301_v44 = vld [vmem:[%s1372_s27 + $0x90] sm:$0xff] }
  0x17   : > { %v324_v42 = vpack.c.bf16 %v302_v40, %v300_v39  ;;  %v304_v45 = vld [vmem:[%s1372_s27 + $0xa8] sm:$0xff]  ;;  %v306_v46 = vld [vmem:[%s1372_s27 + $0xb8] sm:$0xff]  ;;  %v323_v47 = vpack.c.bf16 %v301_v44, %v299_v43  ;;  %v303_v49 = vld [vmem:[%s1372_s27 + $0xa0] sm:$0xff] }
  0x18   : > { %v326_v48 = vpack.c.bf16 %v306_v46, %v304_v45  ;;  %v305_v50 = vld [vmem:[%s1372_s27 + $0xb0] sm:$0xff]  ;;  %v308_v51 = vld [vmem:[%s1372_s27 + $0xc8] sm:$0xff]  ;;  %v310_v52 = vld [vmem:[%s1372_s27 + $0xd8] sm:$0xff] }
  0x19   : > { %1129 = vmatpush3.bf16.msra.mxu0 %v1232_v7  ;;  %v325_v53 = vpack.c.bf16 %v305_v50, %v303_v49  ;;  %v328_v54 = vpack.c.bf16 %v310_v52, %v308_v51  ;;  %v307_v55 = vld [vmem:[%s1372_s27 + $0xc0] sm:$0xff]  ;;  %v309_v56 = vld [vmem:[%s1372_s27 + $0xd0] sm:$0xff]  ;;  %v312_v57 = vld [vmem:[%s1372_s27 + $0xe8] sm:$0xff] }
  0x1a   : > { %1130 = vmatprep.subr.bf16.mxu0 %v1233_v8  ;;  %v314_v58 = vld [vmem:[%s1372_s27 + $0xf8] sm:$0xff]  ;;  %v327_v59 = vpack.c.bf16 %v309_v56, %v307_v55  ;;  %v311_v61 = vld [vmem:[%s1372_s27 + $0xe0] sm:$0xff]  ;;  %v313_v62 = vld [vmem:[%s1372_s27 + $0xf0] sm:$0xff] }
  0x1b   : > { %v330_v60 = vpack.c.bf16 %v314_v58, %v312_v57  ;;  %v329_v63 = vpack.c.bf16 %v313_v62, %v311_v61  ;;  %v1430_v2 = vld [vmem:[%s1694_s2] ss:$0 sm:$0xff]  ;;  %v1444_v11 = vld [vmem:[%s1695_s3 + $0x8] sm:$0xff] }
  0x1c   : > { %v1435_v5 = vld [vmem:[%s1695_s3] sm:$0xff] }
  0x1d   : > { %1131 = vmatpush3.bf16.msra.mxu0 %v1234_v9 }
  0x1e   : > { %1132 = vmatprep.subr.bf16.mxu0 %v1235_v10 }
  0x21   : > { %1133 = vmatpush3.bf16.msra.mxu0 %v1236_v14 }
  0x22   : > { %1134 = vmatprep.subr.bf16.mxu0 %v1237_v15 }
  0x25   : > { %1135 = vmatpush3.bf16.msra.mxu0 %v1238_v16 }
  0x26   : > { %1136 = vmatprep.subr.bf16.mxu0 %v1239_v17 }
  0x29   : > { %1137 = vmatpush3.bf16.msra.mxu0 %v1240_v18 }
  0x2c   : > { %492 = vmatmul.mubr.bf16.vlgmr.msra.gmra.mxu0 %v315_v23 }
  0x2d   : > { %499 = vmatprep.mubr.bf16.mxu0 %v318_v24 }
  0x34   : > { %500 = vmatmul.mubr.bf16.gmra.mxu0 %v317_v29 }
  0x35   : > { %507 = vmatprep.mubr.bf16.mxu0 %v320_v30 }
  0x3c   : > { %508 = vmatmul.mubr.bf16.gmra.mxu0 %v319_v35 }
  0x3d   : > { %515 = vmatprep.mubr.bf16.mxu0 %v322_v36 }
  0x44   : > { %516 = vmatmul.mubr.bf16.gmra.mxu0 %v321_v41 }
  0x45   : > { %523 = vmatprep.mubr.bf16.mxu0 %v324_v42 }
  0x4c   : > { %524 = vmatmul.mubr.bf16.gmra.mxu0 %v323_v47 }
  0x4d   : > { %531 = vmatprep.mubr.bf16.mxu0 %v326_v48 }
  0x54   : > { %532 = vmatmul.mubr.bf16.gmra.mxu0 %v325_v53 }
  0x55   : > { %539 = vmatprep.mubr.bf16.mxu0 %v328_v54 }
  0x5c   : > { %540 = vmatmul.mubr.bf16.gmra.mxu0 %v327_v59 }
  0x5d   : > { %547 = vmatprep.mubr.bf16.mxu0 %v330_v60 }
  0x64   : > { %548 = vmatmul.mubr.bf16.gmra.mxu0 %v329_v63 }
  0xec   : > { %v1138_v0 = vpop.f32.mrf.mxu0 }
  0xee   : > { %v1139_v1 = vpop.f32.mrf.mxu0 }
  0xef   : > { %v1140_v3 = vadd.f32 %v1139_v1, %v1138_v0 }
  0xf0   : > { %v1141_v4 = vpop.f32.mrf.mxu0 }
  0xf1   : > { %v563_v6 = vadd.f32 %v1140_v3, %v1430_v2 }
  0xf2   : > { %v1142_v7 = vpop.f32.mrf.mxu0 }
  0xf3   : > { %v1143_v8 = vadd.f32 %v1142_v7, %v1141_v4  ;;  %v1439_v9 = vadd.f32 %v1435_v5, %v563_v6 }
  0xf4   : > { %v1144_v10 = vpop.f32.mrf.mxu0 }
  0xf5   : > { %v564_v12 = vadd.f32 %v1143_v8, %v1430_v2  ;;  %597 = vadd.xlane.f32.xlu0 %v1439_v9 }
  0xf6   : > { %v1145_v13 = vpop.f32.mrf.mxu0 }
  0xf7   : > { %v1146_v14 = vadd.f32 %v1145_v13, %v1144_v10  ;;  %v1449_v15 = vadd.f32 %v1444_v11, %v564_v12 }
  0xf8   : > { %v1147_v16 = vpop.f32.mrf.mxu0 }
  0xf9   : > { %v565_v17 = vadd.f32 %v1146_v14, %v1430_v2  ;;  %599 = vadd.xlane.f32.xlu0 %v1449_v15 }
  0xfa   : > { %v1148_v18 = vpop.f32.mrf.mxu0 }
  0xfb   : > { %v1149_v19 = vadd.f32 %v1148_v18, %v1147_v16  ;;  %v1454_v20 = vadd.f32 %v1435_v5, %v565_v17 }
  0xfc   : > { %v1150_v21 = vpop.f32.mrf.mxu0 }
  0xfd   : > { %v566_v22 = vadd.f32 %v1149_v19, %v1430_v2  ;;  %601 = vadd.xlane.f32.xlu1 %v1454_v20 }
  0xfe   : > { %v1151_v23 = vpop.f32.mrf.mxu0 }
  0xff   : > { %v1152_v24 = vadd.f32 %v1151_v23, %v1150_v21  ;;  %v1459_v25 = vadd.f32 %v1444_v11, %v566_v22 }
 0x100   : > { %v1153_v26 = vpop.f32.mrf.mxu0 }
 0x101   : > { %v567_v27 = vadd.f32 %v1152_v24, %v1430_v2  ;;  %603 = vadd.xlane.f32.xlu1 %v1459_v25 }
 0x102   : > { %v1154_v28 = vpop.f32.mrf.mxu0 }
 0x103   : > { %v1155_v29 = vadd.f32 %v1154_v28, %v1153_v26  ;;  %v1464_v30 = vadd.f32 %v1435_v5, %v567_v27 }
 0x104   : > { %v1156_v31 = vpop.f32.mrf.mxu0 }
 0x105   : > { %v568_v32 = vadd.f32 %v1155_v29, %v1430_v2  ;;  %605 = vadd.xlane.f32.xlu0 %v1464_v30 }
 0x106   : > { %v1157_v33 = vpop.f32.mrf.mxu0 }
 0x107   : > { %v1158_v34 = vadd.f32 %v1157_v33, %v1156_v31  ;;  %v1469_v35 = vadd.f32 %v1444_v11, %v568_v32 }
 0x108   : > { %v1159_v36 = vpop.f32.mrf.mxu0 }
 0x109   : > { %v569_v37 = vadd.f32 %v1158_v34, %v1430_v2  ;;  %607 = vadd.xlane.f32.xlu1 %v1469_v35 }
 0x10a   : > { %v1160_v38 = vpop.f32.mrf.mxu0 }
 0x10b   : > { %v1161_v39 = vadd.f32 %v1160_v38, %v1159_v36  ;;  %v1474_v40 = vadd.f32 %v1435_v5, %v569_v37 }
 0x10c   : > { %v1162_v41 = vpop.f32.mrf.mxu0 }
 0x10d   : > { %v570_v42 = vadd.f32 %v1161_v39, %v1430_v2  ;;  %609 = vadd.xlane.f32.xlu0 %v1474_v40 }
 0x10e   : > { %v1163_v43 = vpop.f32.mrf.mxu0 }
 0x10f   : > { %v1164_v44 = vadd.f32 %v1163_v43, %v1162_v41  ;;  %v1479_v45 = vadd.f32 %v1444_v11, %v570_v42 }
 0x110   : > { %v1165_v46 = vpop.f32.mrf.mxu0 }
 0x111   : > { %v571_v47 = vadd.f32 %v1164_v44, %v1430_v2  ;;  %611 = vadd.xlane.f32.xlu1 %v1479_v45 }
 0x112   : > { %v1166_v48 = vpop.f32.mrf.mxu0 }
 0x113   : > { %v1167_v49 = vadd.f32 %v1166_v48, %v1165_v46  ;;  %v1484_v50 = vadd.f32 %v1435_v5, %v571_v47 }
 0x114   : > { %v1168_v51 = vpop.f32.mrf.mxu0 }
 0x115   : > { %v572_v52 = vadd.f32 %v1167_v49, %v1430_v2  ;;  %613 = vadd.xlane.f32.xlu0 %v1484_v50 }
 0x116   : > { %v1169_v53 = vpop.f32.mrf.mxu0 }
 0x117   : > { %v1170_v54 = vadd.f32 %v1169_v53, %v1168_v51  ;;  %v1489_v55 = vadd.f32 %v1444_v11, %v572_v52 }
 0x118   : > { %v1171_v56 = vpop.f32.mrf.mxu0 }
 0x119   : > { %v573_v57 = vadd.f32 %v1170_v54, %v1430_v2  ;;  %615 = vadd.xlane.f32.xlu1 %v1489_v55 }
 0x11a   : > { %v1172_v58 = vpop.f32.mrf.mxu0 }
 0x11b   : > { %v1173_v59 = vadd.f32 %v1172_v58, %v1171_v56  ;;  %v1494_v60 = vadd.f32 %v1435_v5, %v573_v57 }
 0x11c   : > { %v1174_v61 = vpop.f32.mrf.mxu0 }
 0x11d   : > { %v574_v62 = vadd.f32 %v1173_v59, %v1430_v2  ;;  %617 = vadd.xlane.f32.xlu0 %v1494_v60 }
 0x11e   : > { %v1175_v63 = vpop.f32.mrf.mxu0 }
 0x11f   : > { %v1176_v0 = vadd.f32 %v1175_v63, %v1174_v61  ;;  %v1499_v1 = vadd.f32 %v1444_v11, %v574_v62 }
 0x120   : > { %v1177_v3 = vpop.f32.mrf.mxu0 }
 0x121   : > { %v575_v4 = vadd.f32 %v1176_v0, %v1430_v2  ;;  %619 = vadd.xlane.f32.xlu1 %v1499_v1 }
 0x122   : > { %v1178_v6 = vpop.f32.mrf.mxu0 }
 0x123   : > { %v1179_v7 = vadd.f32 %v1178_v6, %v1177_v3  ;;  %v1504_v8 = vadd.f32 %v1435_v5, %v575_v4 }
 0x124   : > { %v1180_v10 = vpop.f32.mrf.mxu0 }
 0x125   : > { %v576_v12 = vadd.f32 %v1179_v7, %v1430_v2  ;;  %621 = vadd.xlane.f32.xlu0 %v1504_v8 }
 0x126   : > { %v1181_v13 = vpop.f32.mrf.mxu0 }
 0x127   : > { %v1182_v14 = vadd.f32 %v1181_v13, %v1180_v10  ;;  %v1509_v16 = vadd.f32 %v1444_v11, %v576_v12 }
 0x128   : > { %v1183_v17 = vpop.f32.mrf.mxu0 }
 0x129   : > { %v577_v18 = vadd.f32 %v1182_v14, %v1430_v2  ;;  %623 = vadd.xlane.f32.xlu1 %v1509_v16 }
 0x12a   : > { %v1184_v19 = vpop.f32.mrf.mxu0 }
 0x12b   : > { %v1185_v21 = vadd.f32 %v1184_v19, %v1183_v17  ;;  %v1514_v22 = vadd.f32 %v1435_v5, %v577_v18 }
 0x12d   : > { %v578_v23 = vadd.f32 %v1185_v21, %v1430_v2  ;;  %625 = vadd.xlane.f32.xlu0 %v1514_v22 }
 0x12f   : > { %v1519_v24 = vadd.f32 %v1444_v11, %v578_v23 }
 0x131   : > { %627 = vadd.xlane.f32.xlu1 %v1519_v24 }
 0x17e   : > { %v598_v26 = vpop.xlane.xlu0 %597 }
 0x17f   : > { %v630_v27 = vmul.f32 0.0078125, %v598_v26 }
 0x181   : > { %v1523_v28 = vsub.f32 %v1439_v9, %v630_v27 }
 0x182   : > { %v600_v29 = vpop.xlane.xlu0 %599 }
 0x183   : > { %v631_v31 = vmul.f32 0.0078125, %v600_v29  ;;  %v662_v5 = vmul.f32 %v1523_v28, %v1523_v28  ;;  %v1241_v29 = vld [vmem:[%s1698_s6 + $0x38] sm:$0xff]  }
 0x185   : > { %v1528_v32 = vsub.f32 %v1449_v15, %v631_v31  ;;  %678 = vadd.xlane.f32.xlu0 %v662_v5  ;;  %v1242_v31 = vld [vmem:[%s1698_s6 + $0x30] sm:$0xff]   ;;  %v1244_v5 = vld [vmem:[%s1698_s6 + $0x20] sm:$0xff]  }
 0x186   : > { %v602_v2 = vpop.xlane.xlu1 %601 }
 0x187   : > { %v632_v33 = vmul.f32 0.0078125, %v602_v2  ;;  %v663_v11 = vmul.f32 %v1528_v32, %v1528_v32  ;;  %v1245_v2 = vld [vmem:[%s1698_s6 + $0x18] sm:$0xff]  }
 0x189   : > { %v1533_v34 = vsub.f32 %v1454_v20, %v632_v33  ;;  %680 = vadd.xlane.f32.xlu1 %v663_v11  ;;  %v1246_v33 = vld [vmem:[%s1698_s6 + $0x10] sm:$0xff]   ;;  %v1247_v11 = vld [vmem:[%s1698_s6 + $0x8] sm:$0xff]  }
 0x18a   : > { %v604_v9 = vpop.xlane.xlu1 %603 }
 0x18b   : > { %v633_v36 = vmul.f32 0.0078125, %v604_v9  ;;  %v664_v37 = vmul.f32 %v1533_v34, %v1533_v34  ;;  %v1248_v9 = vld [vmem:[%s1698_s6] sm:$0xff]  }
 0x18d   : > { %v1538_v38 = vsub.f32 %v1459_v25, %v633_v36  ;;  %682 = vadd.xlane.f32.xlu0 %v664_v37 }
 0x18e   : > { %v606_v15 = vpop.xlane.xlu0 %605 }
 0x18f   : > { %v634_v39 = vmul.f32 0.0078125, %v606_v15  ;;  %v665_v41 = vmul.f32 %v1538_v38, %v1538_v38 }
 0x191   : > { %v1543_v42 = vsub.f32 %v1464_v30, %v634_v39  ;;  %684 = vadd.xlane.f32.xlu1 %v665_v41 }
 0x192   : > { %v608_v20 = vpop.xlane.xlu1 %607 }
 0x193   : > { %v635_v43 = vmul.f32 0.0078125, %v608_v20  ;;  %v666_v44 = vmul.f32 %v1543_v42, %v1543_v42 }
 0x195   : > { %v1548_v46 = vsub.f32 %v1469_v35, %v635_v43  ;;  %686 = vadd.xlane.f32.xlu0 %v666_v44 }
 0x196   : > { %v610_v25 = vpop.xlane.xlu0 %609 }
 0x197   : > { %v636_v47 = vmul.f32 0.0078125, %v610_v25  ;;  %v667_v48 = vmul.f32 %v1548_v46, %v1548_v46 }
 0x199   : > { %v1553_v49 = vsub.f32 %v1474_v40, %v636_v47  ;;  %688 = vadd.xlane.f32.xlu1 %v667_v48 }
 0x19a   : > { %v612_v30 = vpop.xlane.xlu1 %611 }
 0x19b   : > { %v637_v51 = vmul.f32 0.0078125, %v612_v30  ;;  %v668_v52 = vmul.f32 %v1553_v49, %v1553_v49 }
 0x19d   : > { %v1558_v53 = vsub.f32 %v1479_v45, %v637_v51  ;;  %690 = vadd.xlane.f32.xlu0 %v668_v52 }
 0x19e   : > { %v614_v35 = vpop.xlane.xlu0 %613 }
 0x19f   : > { %v638_v54 = vmul.f32 0.0078125, %v614_v35  ;;  %v669_v56 = vmul.f32 %v1558_v53, %v1558_v53 }
 0x1a1   : > { %v1563_v57 = vsub.f32 %v1484_v50, %v638_v54  ;;  %692 = vadd.xlane.f32.xlu1 %v669_v56 }
 0x1a2   : > { %v616_v40 = vpop.xlane.xlu1 %615 }
 0x1a3   : > { %v639_v58 = vmul.f32 0.0078125, %v616_v40  ;;  %v670_v59 = vmul.f32 %v1563_v57, %v1563_v57 }
 0x1a5   : > { %v1568_v61 = vsub.f32 %v1489_v55, %v639_v58  ;;  %694 = vadd.xlane.f32.xlu0 %v670_v59 }
 0x1a6   : > { %v618_v45 = vpop.xlane.xlu0 %617 }
 0x1a7   : > { %v640_v62 = vmul.f32 0.0078125, %v618_v45  ;;  %v671_v63 = vmul.f32 %v1568_v61, %v1568_v61 }
 0x1a9   : > { %v1573_v0 = vsub.f32 %v1494_v60, %v640_v62  ;;  %696 = vadd.xlane.f32.xlu1 %v671_v63 }
 0x1aa   : > { %v620_v50 = vpop.xlane.xlu1 %619 }
 0x1ab   : > { %v641_v3 = vmul.f32 0.0078125, %v620_v50  ;;  %v672_v4 = vmul.f32 %v1573_v0, %v1573_v0 }
 0x1ad   : > { %v1578_v6 = vsub.f32 %v1499_v1, %v641_v3  ;;  %698 = vadd.xlane.f32.xlu0 %v672_v4 }
 0x1ae   : > { %v622_v55 = vpop.xlane.xlu0 %621 }
 0x1af   : > { %v642_v7 = vmul.f32 0.0078125, %v622_v55  ;;  %v673_v10 = vmul.f32 %v1578_v6, %v1578_v6 }
 0x1b1   : > { %v1583_v12 = vsub.f32 %v1504_v8, %v642_v7  ;;  %700 = vadd.xlane.f32.xlu1 %v673_v10 }
 0x1b2   : > { %v624_v60 = vpop.xlane.xlu1 %623 }
 0x1b3   : > { %v643_v13 = vmul.f32 0.0078125, %v624_v60  ;;  %v674_v14 = vmul.f32 %v1583_v12, %v1583_v12 }
 0x1b5   : > { %v1588_v17 = vsub.f32 %v1509_v16, %v643_v13  ;;  %702 = vadd.xlane.f32.xlu0 %v674_v14 }
 0x1b6   : > { %v626_v1 = vpop.xlane.xlu0 %625 }
 0x1b7   : > { %v644_v18 = vmul.f32 0.0078125, %v626_v1  ;;  %v675_v19 = vmul.f32 %v1588_v17, %v1588_v17 }
 0x1b9   : > { %v1593_v21 = vsub.f32 %v1514_v22, %v644_v18  ;;  %704 = vadd.xlane.f32.xlu1 %v675_v19  ;;  %v1289_v22 = vmov 0.0  }
 0x1ba   : > { %v628_v8 = vpop.xlane.xlu1 %627  ;;  %1195 = vmatprep.subr.bf16.mxu1 %v1289_v22  ;;  %1211 = vmatprep.mubr.msk.bf16.mxu1 %vm1290_vm0, %v1289_v22 }
 0x1bb   : > { %v645_v23 = vmul.f32 0.0078125, %v628_v8  ;;  %v676_v26 = vmul.f32 %v1593_v21, %v1593_v21  ;;  %1196 = vmatpush3.bf16.msra.mxu1 %v1241_v29 }
 0x1bc   : > { %1197 = vmatprep.subr.bf16.mxu1 %v1289_v22 }
 0x1bd   : > { %v1598_v27 = vsub.f32 %v1519_v24, %v645_v23  ;;  %706 = vadd.xlane.f32.xlu0 %v676_v26  ;;  %v1243_v24 = vld [vmem:[%s1698_s6 + $0x28] sm:$0xff]  }
 0x1bf   : > { %v677_v16 = vmul.f32 %v1598_v27, %v1598_v27  ;;  %1198 = vmatpush3.bf16.msra.mxu1 %v1242_v31 }
 0x1c0   : > { %1199 = vmatprep.subr.bf16.mxu1 %v1289_v22 }
 0x1c1   : > { %708 = vadd.xlane.f32.xlu1 %v677_v16 }
 0x1c3   : > { %1200 = vmatpush3.bf16.msra.mxu1 %v1243_v24 }
 0x1c4   : > { %1201 = vmatprep.subr.bf16.mxu1 %v1289_v22 }
 0x1c7   : > { %1202 = vmatpush3.bf16.msra.mxu1 %v1244_v5 }
 0x1c8   : > { %1203 = vmatprep.subr.bf16.mxu1 %v1289_v22 }
 0x1cb   : > { %1204 = vmatpush3.bf16.msra.mxu1 %v1245_v2 }
 0x1cc   : > { %1205 = vmatprep.subr.bf16.mxu1 %v1289_v22 }
 0x1cf   : > { %1206 = vmatpush3.bf16.msra.mxu1 %v1246_v33 }
 0x1d0   : > { %1207 = vmatprep.subr.bf16.mxu1 %v1289_v22 }
 0x1d3   : > { %1208 = vmatpush3.bf16.msra.mxu1 %v1247_v11 }
 0x1d4   : > { %1209 = vmatprep.subr.bf16.mxu1 %v1289_v22 }
 0x1d7   : > { %1210 = vmatpush3.bf16.msra.mxu1 %v1248_v9 }
 0x20e   : > { %v679_v36 = vpop.xlane.xlu0 %678 }
 0x20f   : > { %v710_v41 = vmul.f32 0.0078125, %v679_v36  ;;  %v1632_v36 = vld [vmem:[%s1696_s4] ss:$0 sm:$0xff] }
 0x211   : > { %v726_v48 = vadd.f32 1e-05, %v710_v41 }
 0x212   : > { %v681_v37 = vpop.xlane.xlu1 %680 }
 0x213   : > { %v711_v43 = vmul.f32 0.0078125, %v681_v37  ;;  %1249 = vrsqrt.f32 %v726_v48 }
 0x215   : > { %v727_v52 = vadd.f32 1e-05, %v711_v43 }
 0x216   : > { %v683_v15 = vpop.xlane.xlu0 %682 }
 0x217   : > { %v712_v47 = vmul.f32 0.0078125, %v683_v15  ;;  %1251 = vrsqrt.f32 %v727_v52 }
 0x219   : > { %v728_v56 = vadd.f32 1e-05, %v712_v47 }
 0x21a   : > { %v685_v39 = vpop.xlane.xlu1 %684 }
 0x21b   : > { %v713_v25 = vmul.f32 0.0078125, %v685_v39 }
 0x21d   : > { %v729_v35 = vadd.f32 1e-05, %v713_v25 }
 0x21e   : > { %v687_v20 = vpop.xlane.xlu0 %686 }
 0x21f   : > { %v714_v54 = vmul.f32 0.0078125, %v687_v20  ;;  %1253 = vrsqrt.f32 %v729_v35 }
 0x220   : > { %1255 = vrsqrt.f32 %v728_v56  ;;  %v1250_v14 = vpop.eup %1249 }
 0x221   : > { %v730_v62 = vadd.f32 1e-05, %v714_v54 }
 0x222   : > { %v689_v44 = vpop.xlane.xlu1 %688 }
 0x223   : > { %v715_v30 = vmul.f32 0.0078125, %v689_v44 }
 0x224   : > { %v1252_v18 = vpop.eup %1251 }
 0x225   : > { %v731_v58 = vadd.f32 1e-05, %v715_v30  ;;  %v759_v37 = vmul.f32 %v1252_v18, %v1528_v32 }
 0x226   : > { %v691_v51 = vpop.xlane.xlu0 %690 }
 0x227   : > { %v716_v40 = vmul.f32 0.0078125, %v691_v51  ;;  %1257 = vrsqrt.f32 %v731_v58 }
 0x229   : > { %v732_v63 = vadd.f32 1e-05, %v716_v40 }
 0x22a   : > { %v693_v59 = vpop.xlane.xlu1 %692 }
 0x22b   : > { %v717_v45 = vmul.f32 0.0078125, %v693_v59 }
 0x22c   : > { %v1254_v19 = vpop.eup %1253 }
 0x22d   : > { %v733_v50 = vadd.f32 1e-05, %v717_v45  ;;  %v1256_v23 = vpop.eup %1255  ;;  %v761_v22 = vmul.f32 %v1254_v19, %v1538_v38 }
 0x22e   : > { %v695_v3 = vpop.xlane.xlu0 %694  ;;  %v760_v2 = vmul.f32 %v1256_v23, %v1533_v34  ;;  %v758_v34 = vmul.f32 %v1250_v14, %v1523_v28 }
 0x22f   : > { %1259 = vrsqrt.f32 %v733_v50  ;;  %v718_v4 = vmul.f32 0.0078125, %v695_v3  ;;  %v784_v41 = vmul.f32 %v1632_v36, %v761_v22 }
 0x230   : > { %1261 = vrsqrt.f32 %v730_v62  ;;  %v783_v44 = vmul.f32 %v1632_v36, %v760_v2  ;;  %v781_v52 = vmul.f32 %v1632_v36, %v758_v34 }
 0x231   : > { %1263 = vrsqrt.f32 %v732_v63  ;;  %v734_v55 = vadd.f32 1e-05, %v718_v4 }
 0x232   : > { %v697_v7 = vpop.xlane.xlu1 %696 }
 0x233   : > { %1265 = vrsqrt.f32 %v734_v55  ;;  %v719_v10 = vmul.f32 0.0078125, %v697_v7 }
 0x234   : > { %v1258_v16 = vpop.eup %1257 }
 0x235   : > { %v735_v60 = vadd.f32 1e-05, %v719_v10  ;;  %v763_v33 = vmul.f32 %v1258_v16, %v1548_v46 }
 0x236   : > { %v699_v13 = vpop.xlane.xlu0 %698 }
 0x237   : > { %v720_v1 = vmul.f32 0.0078125, %v699_v13  ;;  %1267 = vrsqrt.f32 %v735_v60  ;;  %v786_v25 = vmul.f32 %v1632_v36, %v763_v33 }
 0x239   : > { %v736_v8 = vadd.f32 1e-05, %v720_v1 }
 0x23a   : > { %v701_v26 = vpop.xlane.xlu1 %700 }
 0x23b   : > { %1269 = vrsqrt.f32 %v736_v8  ;;  %v721_v31 = vmul.f32 0.0078125, %v701_v26 }
 0x23c   : > { %v1260_v29 = vpop.eup %1259 }
 0x23d   : > { %v1262_v24 = vpop.eup %1261  ;;  %v737_v11 = vadd.f32 1e-05, %v721_v31  ;;  %v765_v15 = vmul.f32 %v1260_v29, %v1558_v53  ;;  %v1646_v53 = vld [vmem:[%s1697_s5] ss:$0 sm:$0xff] }
 0x23e   : > { %v1264_v5 = vpop.eup %1263  ;;  %v703_v9 = vpop.xlane.xlu0 %702  ;;  %v762_v20 = vmul.f32 %v1262_v24, %v1543_v42  ;;  %v782_v42 = vmul.f32 %v1632_v36, %v759_v37  ;;  %v806_v54 = vadd.f32 %v1646_v53, %v783_v44  ;;  %v809_v56 = vadd.f32 %v1646_v53, %v786_v25 }
 0x23f   : > { %v722_v39 = vmul.f32 0.0078125, %v703_v9  ;;  %1271 = vrsqrt.f32 %v737_v11  ;;  %v764_v46 = vmul.f32 %v1264_v5, %v1553_v49  ;;  %v788_v48 = vmul.f32 %v1632_v36, %v765_v15 }
 0x240   : > { %v1266_v38 = vpop.eup %1265  ;;  %v807_v49 = vadd.f32 %v1646_v53, %v784_v41  ;;  %v785_v30 = vmul.f32 %v1632_v36, %v762_v20  ;;  %v805_v45 = vadd.f32 %v1646_v53, %v782_v42  ;;  %v804_v7 = vadd.f32 %v1646_v53, %v781_v52 }
 0x241   : > { %v738_v43 = vadd.f32 1e-05, %v722_v39  ;;  %v766_v32 = vmul.f32 %v1266_v38, %v1563_v57  ;;  %v787_v57 = vmul.f32 %v1632_v36, %v764_v46  ;;  %v811_v62 = vadd.f32 %v1646_v53, %v788_v48 }
 0x242   : > { %v705_v47 = vpop.xlane.xlu1 %704  ;;  %v827_v3 = vadd.f32 %v807_v49, %v806_v54  ;;  %v808_v4 = vadd.f32 %v1646_v53, %v785_v30  ;;  %v820_v19 = vadd.f32 %v805_v45, %v804_v7 }
 0x243   : > { %1273 = vrsqrt.f32 %v738_v43  ;;  %v723_v28 = vmul.f32 0.0078125, %v705_v47  ;;  %v789_v40 = vmul.f32 %v1632_v36, %v766_v32  ;;  %v810_v10 = vadd.f32 %v1646_v53, %v787_v57 }
 0x244   : > { %v1268_v51 = vpop.eup %1267  ;;  %v834_v13 = vadd.f32 %v809_v56, %v808_v4  ;;  %v828_v26 = vrot.slane %v827_v3, 4  ;;  %v821_v2 = vrot.slane %v820_v19, 4 }
 0x245   : > { %v739_v35 = vadd.f32 1e-05, %v723_v28  ;;  %v767_v58 = vmul.f32 %v1268_v51, %v1568_v61  ;;  %v812_v61 = vadd.f32 %v1646_v53, %v789_v40  ;;  %v841_v8 = vadd.f32 %v811_v62, %v810_v10 }
 0x246   : > { %v707_v59 = vpop.xlane.xlu0 %706  ;;  %v835_v31 = vrot.slane %v834_v13, 4  ;;  %v829_v9 = vadd.f32 %v828_v26, %v827_v3  ;;  %v822_v20 = vadd.f32 %v821_v2, %v820_v19 }
 0x247   : > { %1275 = vrsqrt.f32 %v739_v35  ;;  %v724_v63 = vmul.f32 0.0078125, %v707_v59  ;;  %v790_v55 = vmul.f32 %v1632_v36, %v767_v58  ;;  %v842_v33 = vrot.slane %v841_v8, 4 }
 0x248   : > { %v1270_v50 = vpop.eup %1269  ;;  %v836_v39 = vadd.f32 %v835_v31, %v834_v13  ;;  %v830_v43 = vrot.slane %v829_v9, 2  ;;  %v823_v48 = vrot.slane %v822_v20, 2 }
 0x249   : > { %v740_v60 = vadd.f32 1e-05, %v724_v63  ;;  %v813_v14 = vadd.f32 %v1646_v53, %v790_v55  ;;  %v768_v1 = vmul.f32 %v1270_v50, %v1573_v0  ;;  %v843_v34 = vadd.f32 %v842_v33, %v841_v8 }
 0x24a   : > { %v709_v18 = vpop.xlane.xlu1 %708  ;;  %v837_v47 = vrot.slane %v836_v39, 2  ;;  %v831_v30 = vadd.f32 %v830_v43, %v829_v9  ;;  %v824_v58 = vadd.f32 %v823_v48, %v822_v20 }
 0x24b   : > { %1277 = vrsqrt.f32 %v740_v60  ;;  %v725_v23 = vmul.f32 0.0078125, %v709_v18  ;;  %v848_v16 = vadd.f32 %v813_v14, %v812_v61  ;;  %v791_v24 = vmul.f32 %v1632_v36, %v768_v1 }
 0x24c   : > { %v1272_v29 = vpop.eup %1271  ;;  %v844_v28 = vrot.slane %v843_v34, 2  ;;  %v838_v56 = vadd.f32 %v837_v47, %v836_v39  ;;  %v832_v62 = vrot.slane %v831_v30, 1  ;;  %v825_v60 = vrot.slane %v824_v58, 1 }
 0x24d   : > { %v741_v22 = vadd.f32 1e-05, %v725_v23  ;;  %v769_v5 = vmul.f32 %v1272_v29, %v1578_v6  ;;  %v849_v37 = vrot.slane %v848_v16, 4  ;;  %v814_v38 = vadd.f32 %v1646_v53, %v791_v24 }
 0x24e   : > { %v839_v7 = vrot.slane %v838_v56, 1  ;;  %v833_v61 = vadd.f32 %v832_v62, %v831_v30  ;;  %v826_v26 = vadd.f32 %v825_v60, %v824_v58 }
 0x24f   : > { %1279 = vrsqrt.f32 %v741_v22  ;;  %v792_v0 = vmul.f32 %v1632_v36, %v769_v5  ;;  %v850_v6 = vadd.f32 %v849_v37, %v848_v16 }
 0x250   : > { %v1274_v11 = vpop.eup %1273  ;;  %v840_v23 = vadd.f32 %v839_v7, %v838_v56  ;;  %v878_v5 = vmul.f32 0.0625, %v833_v61  ;;  %v877_v9 = vmul.f32 0.0625, %v826_v26 }
 0x251   : > { %v770_v15 = vmul.f32 %v1274_v11, %v1583_v12  ;;  %v815_v41 = vadd.f32 %v1646_v53, %v792_v0  ;;  %v851_v51 = vrot.slane %v850_v6, 2 }
 0x252   : > { %v879_v2 = vmul.f32 0.0625, %v840_v23  ;;  %v886_v39 = vpack.c.bf16 %v878_v5, %v878_v5 }
 0x253   : > { %v855_v44 = vadd.f32 %v815_v41, %v814_v38  ;;  %v793_v25 = vmul.f32 %v1632_v36, %v770_v15  ;;  %v852_v63 = vadd.f32 %v851_v51, %v850_v6 }
 0x254   : > { %v1276_v46 = vpop.eup %1275  ;;  %v887_v41 = vpack.c.bf16 %v879_v2, %v879_v2 }
 0x255   : > { %v771_v32 = vmul.f32 %v1276_v46, %v1588_v17  ;;  %v856_v42 = vrot.slane %v855_v44, 4  ;;  %v816_v57 = vadd.f32 %v1646_v53, %v793_v25  ;;  %v845_v17 = vadd.f32 %v844_v28, %v843_v34 }
 0x256   : > { %v853_v14 = vrot.slane %v852_v63, 1  ;;  %v885_v34 = vpack.c.bf16 %v877_v9, %v877_v9  ;;  %v918_v25 = vunpack.c.l.b16 %v886_v39  ;;  %v919_v47 = vunpack.c.l.b16 %v887_v41 }
 0x257   : > { %v794_v12 = vmul.f32 %v1632_v36, %v771_v32  ;;  %v857_v52 = vadd.f32 %v856_v42, %v855_v44  ;;  %v846_v13 = vrot.slane %v845_v17, 1 }
 0x258   : > { %v1278_v49 = vpop.eup %1277  ;;  %v854_v22 = vadd.f32 %v853_v14, %v852_v63  ;;  %v917_v48 = vunpack.c.l.b16 %v885_v34 }
 0x259   : > { %v817_v35 = vadd.f32 %v1646_v53, %v794_v12  ;;  %v772_v54 = vmul.f32 %v1278_v49, %v1593_v21  ;;  %v858_v40 = vrot.slane %v857_v52, 2  ;;  %v847_v16 = vadd.f32 %v846_v13, %v845_v17 }
 0x25a   : > { %v881_v37 = vmul.f32 0.0625, %v854_v22  ;;  %v926_v51 = vsel %vm925_vm1, %v918_v25, %v917_v48 }
 0x25b   : > { %v862_v59 = vadd.f32 %v817_v35, %v816_v57  ;;  %v795_v50 = vmul.f32 %v1632_v36, %v772_v54  ;;  %v859_v4 = vadd.f32 %v858_v40, %v857_v52  ;;  %v880_v0 = vmul.f32 0.0625, %v847_v16 }
 0x25c   : > { %v1280_v45 = vpop.eup %1279  ;;  %v889_v43 = vpack.c.bf16 %v881_v37, %v881_v37  ;;  %v928_v57 = vsel %vm927_vm2, %v919_v47, %v926_v51 }
 0x25d   : > { %v773_v3 = vmul.f32 %v1280_v45, %v1598_v27  ;;  %v863_v55 = vrot.slane %v862_v59, 4  ;;  %v818_v1 = vadd.f32 %v1646_v53, %v795_v50  ;;  %v860_v19 = vrot.slane %v859_v4, 1 }
 0x25e   : > { %v888_v46 = vpack.c.bf16 %v880_v0, %v880_v0  ;;  %v921_v28 = vunpack.c.l.b16 %v889_v43 }
 0x25f   : > { %v796_v10 = vmul.f32 %v1632_v36, %v773_v3  ;;  %v864_v21 = vadd.f32 %v863_v55, %v862_v59  ;;  %v861_v31 = vadd.f32 %v860_v19, %v859_v4 }
 0x260   : > { %v920_v12 = vunpack.c.l.b16 %v888_v46 }
 0x261   : > { %v819_v18 = vadd.f32 %v1646_v53, %v796_v10  ;;  %v865_v8 = vrot.slane %v864_v21, 2  ;;  %v882_v53 = vmul.f32 0.0625, %v861_v31 }
 0x262   : > { %v930_v54 = vsel %vm929_vm3, %v920_v12, %v928_v57 }
 0x263   : > { %v866_v27 = vadd.f32 %v865_v8, %v864_v21  ;;  %v869_v29 = vadd.f32 %v819_v18, %v818_v1  ;;  %v890_v44 = vpack.c.bf16 %v882_v53, %v882_v53  ;;  %v932_v56 = vsel %vm931_vm4, %v921_v28, %v930_v54 }
 0x265   : > { %v867_v24 = vrot.slane %v866_v27, 1  ;;  %v870_v36 = vrot.slane %v869_v29, 4  ;;  %v922_v30 = vunpack.c.l.b16 %v890_v44 }
 0x267   : > { %v868_v33 = vadd.f32 %v867_v24, %v866_v27  ;;  %v871_v11 = vadd.f32 %v870_v36, %v869_v29  ;;  %v934_v58 = vsel %vm933_vm5, %v922_v30, %v932_v56 }
 0x269   : > { %v872_v15 = vrot.slane %v871_v11, 2  ;;  %v883_v38 = vmul.f32 0.0625, %v868_v33 }
 0x26b   : > { %v873_v20 = vadd.f32 %v872_v15, %v871_v11  ;;  %v891_v32 = vpack.c.bf16 %v883_v38, %v883_v38 }
 0x26d   : > { %v874_v6 = vrot.slane %v873_v20, 1  ;;  %v923_v52 = vunpack.c.l.b16 %v891_v32 }
 0x26f   : > { %v875_v42 = vadd.f32 %v874_v6, %v873_v20  ;;  %v936_v17 = vsel %vm935_vm6, %v923_v52, %v934_v58 }
 0x271   : > { %v884_v49 = vmul.f32 0.0625, %v875_v42 }
 0x273   : > { %v892_v35 = vpack.c.bf16 %v884_v49, %v884_v49 }
 0x275   : > { %v924_v40 = vunpack.c.l.b16 %v892_v35 }
 0x277   : > { %v938_v59 = vsel %vm937_vm7, %v924_v40, %v936_v17 }
 0x278   : > { %v939_v45 = vpack.c.b16 %v938_v59, %v938_v59 }
 0x27a   : > { %1212 = vmatmul.mubr.bf16.vlgmr.msra.gmra.mxu1 %v939_v45 }
 0x33a   : > { %v1023_v62 = vpop.f32.mrf.mxu1 }
 0x33b   : > { %1029 = vst [vmem:[%s281_s28] sm:$0xff] %v1023_v62 }
 0x33c   : > { %v1213_v63 = vpop.f32.mrf.mxu1 }
 0x33e   : > { %v1026_v50 = vpop.f32.mrf.mxu1 }
 0x340   : > { %v1214_v3 = vpop.f32.mrf.mxu1 }
 0x341 PF: > { %s17_s24 = sadd.s32 1, %s1287_s24  }
 0x342   : > { %p14_p5 = scmp.ge.s32.totalorder %s17_s24, 4  }
 0x344   :  { %16 = sbr.rel (!%p14_p5) target bundleno = 1 (0x1), region = 78 }

// kernel: domain_incremental_clip_forward.3
= control target key start
LH: loop header
LB: loop body
LE: loop exit
PB: predicated region body
PF: predicated region fallthrough
CT: control target
= control target key end

     0   :  { %vm800_vm0 = vmmov 0   ;;  %s1168_s1 = inlined_call_operand.vmem [shape: f32[128,128], index: 1, kind: input, shape index: {}]   ;;  %s1169_s4 = inlined_call_operand.vmem [shape: bf16[128,128], index: 4, kind: input, shape index: {}]   ;;  %s1170_s2 = inlined_call_operand.vmem [shape: f32[1,128], index: 2, kind: input, shape index: {}]   ;;  %s1171_s3 = inlined_call_operand.vmem [shape: f32[1,128], index: 3, kind: input, shape index: {}]   ;;  %s1172_s5 = inlined_call_operand.vmem [shape: f32[16,128], index: 5, kind: input, shape index: {}]   ;;  %s1173_s0 = inlined_call_operand.<no memory space> [shape: f32[1,1], index: 0, kind: input, shape index: {}]   ;;  %s1174_s6 = inlined_call_operand.vmem [shape: f32[16,128], index: 6, kind: output, shape index: {}]  }
   0x1   :  { %v26_v0 = vld [vmem:[%s1168_s1] sm:$0xff]  ;;  %v28_v1 = vld [vmem:[%s1168_s1 + $0x10] sm:$0xff]  ;;  %v27_v2 = vld [vmem:[%s1168_s1 + $0x8] sm:$0xff] }
   0x2   :  { %42 = vadd.xlane.f32.xlu0 %v26_v0  ;;  %46 = vadd.xlane.f32.xlu1 %v28_v1  ;;  %v29_v3 = vld [vmem:[%s1168_s1 + $0x18] sm:$0xff]  ;;  %v30_v4 = vld [vmem:[%s1168_s1 + $0x20] sm:$0xff]  ;;  %v31_v5 = vld [vmem:[%s1168_s1 + $0x28] sm:$0xff] }
   0x3   :  { %v32_v6 = vld [vmem:[%s1168_s1 + $0x30] sm:$0xff]  ;;  %v33_v7 = vld [vmem:[%s1168_s1 + $0x38] sm:$0xff]  ;;  %v34_v8 = vld [vmem:[%s1168_s1 + $0x40] sm:$0xff] }
   0x4   :  { %v35_v9 = vld [vmem:[%s1168_s1 + $0x48] sm:$0xff]  ;;  %v869_v10 = vld [vmem:[%s1168_s1 + $0x50] sm:$0xff]  ;;  %v874_v11 = vld [vmem:[%s1168_s1 + $0x58] sm:$0xff] }
   0x5   :  { %v881_v12 = vld [vmem:[%s1168_s1 + $0x60] sm:$0xff]  ;;  %v886_v13 = vld [vmem:[%s1168_s1 + $0x68] sm:$0xff]  ;;  %v893_v14 = vld [vmem:[%s1168_s1 + $0x70] sm:$0xff] }
   0x6   :  { %44 = vadd.xlane.f32.xlu0 %v27_v2  ;;  %48 = vadd.xlane.f32.xlu1 %v29_v3  ;;  %v898_v15 = vld [vmem:[%s1168_s1 + $0x78] sm:$0xff]  ;;  %v716_v60 = vld [vmem:[%s1169_s4 + $0x30] sm:$0xff]  }
   0x7   :  { %v715_v51 = vld [vmem:[%s1169_s4 + $0x38] sm:$0xff]  }
   0x8   :  { %661 = vmatprep.subr.bf16.mxu0 %v715_v51 }
   0x9   :  { %662 = vmatpush3.bf16.msra.mxu0 %v715_v51 }
   0xa   :  { %50 = vadd.xlane.f32.xlu0 %v30_v4  ;;  %52 = vadd.xlane.f32.xlu1 %v31_v5 }
   0xb   :  { %663 = vmatprep.subr.bf16.mxu0 %v716_v60 }
   0xd   :  { %664 = vmatpush3.bf16.msra.mxu0 %v716_v60 }
   0xe   :  { %54 = vadd.xlane.f32.xlu0 %v32_v6  ;;  %56 = vadd.xlane.f32.xlu1 %v33_v7 }
  0x12   :  { %58 = vadd.xlane.f32.xlu0 %v34_v8  ;;  %60 = vadd.xlane.f32.xlu1 %v35_v9 }
  0x16   :  { %62 = vadd.xlane.f32.xlu0 %v869_v10  ;;  %64 = vadd.xlane.f32.xlu1 %v874_v11 }
  0x1a   :  { %66 = vadd.xlane.f32.xlu0 %v881_v12  ;;  %68 = vadd.xlane.f32.xlu1 %v886_v13 }
  0x1e   :  { %70 = vadd.xlane.f32.xlu0 %v893_v14  ;;  %72 = vadd.xlane.f32.xlu1 %v898_v15 }
  0x8b   :  { %v43_v16 = vpop.xlane.xlu0 %42  ;;  %v47_v17 = vpop.xlane.xlu1 %46 }
  0x8c   :  { %v75_v18 = vmul.f32 0.0078125, %v43_v16  ;;  %v77_v19 = vmul.f32 0.0078125, %v47_v17 }
  0x8e   :  { %v902_v20 = vsub.f32 %v26_v0, %v75_v18  ;;  %v904_v21 = vsub.f32 %v28_v1, %v77_v19 }
  0x8f   :  { %v45_v22 = vpop.xlane.xlu0 %44  ;;  %v49_v23 = vpop.xlane.xlu1 %48 }
  0x90   :  { %v76_v24 = vmul.f32 0.0078125, %v45_v22  ;;  %v107_v25 = vmul.f32 %v902_v20, %v902_v20  ;;  %v78_v26 = vmul.f32 0.0078125, %v49_v23  ;;  %v109_v29 = vmul.f32 %v904_v21, %v904_v21  ;;  %v719_v23 = vld [vmem:[%s1169_s4 + $0x18] sm:$0xff]  }
  0x92   :  { %v908_v27 = vsub.f32 %v27_v2, %v76_v24  ;;  %123 = vadd.xlane.f32.xlu0 %v107_v25  ;;  %v910_v28 = vsub.f32 %v29_v3, %v78_v26  ;;  %v721_v24 = vld [vmem:[%s1169_s4 + $0x8] sm:$0xff]   ;;  %v722_v25 = vld [vmem:[%s1169_s4] sm:$0xff]  }
  0x93   :  { %v51_v30 = vpop.xlane.xlu0 %50  ;;  %v53_v31 = vpop.xlane.xlu1 %52 }
  0x94   :  { %v79_v32 = vmul.f32 0.0078125, %v51_v30  ;;  %v108_v33 = vmul.f32 %v908_v27, %v908_v27  ;;  %v80_v34 = vmul.f32 0.0078125, %v53_v31  ;;  %v110_v37 = vmul.f32 %v910_v28, %v910_v28 }
  0x96   :  { %v916_v35 = vsub.f32 %v30_v4, %v79_v32  ;;  %127 = vadd.xlane.f32.xlu0 %v109_v29  ;;  %125 = vadd.xlane.f32.xlu1 %v108_v33  ;;  %v918_v36 = vsub.f32 %v31_v5, %v80_v34  ;;  %v717_v5 = vld [vmem:[%s1169_s4 + $0x28] sm:$0xff]  }
  0x97   :  { %v55_v38 = vpop.xlane.xlu0 %54  ;;  %v57_v39 = vpop.xlane.xlu1 %56  ;;  %665 = vmatprep.subr.bf16.mxu0 %v717_v5 }
  0x98   :  { %v81_v40 = vmul.f32 0.0078125, %v55_v38  ;;  %v111_v41 = vmul.f32 %v916_v35, %v916_v35  ;;  %v82_v42 = vmul.f32 0.0078125, %v57_v39  ;;  %v112_v45 = vmul.f32 %v918_v36, %v918_v36  ;;  %666 = vmatpush3.bf16.msra.mxu0 %v717_v5 }
  0x9a   :  { %v924_v43 = vsub.f32 %v32_v6, %v81_v40  ;;  %129 = vadd.xlane.f32.xlu1 %v110_v37  ;;  %131 = vadd.xlane.f32.xlu0 %v111_v41  ;;  %v926_v44 = vsub.f32 %v33_v7, %v82_v42 }
  0x9b   :  { %v59_v46 = vpop.xlane.xlu0 %58  ;;  %v61_v47 = vpop.xlane.xlu1 %60 }
  0x9c   :  { %v83_v48 = vmul.f32 0.0078125, %v59_v46  ;;  %v113_v49 = vmul.f32 %v924_v43, %v924_v43  ;;  %v84_v50 = vmul.f32 0.0078125, %v61_v47  ;;  %v114_v54 = vmul.f32 %v926_v44, %v926_v44 }
  0x9e   :  { %v935_v52 = vsub.f32 %v34_v8, %v83_v48  ;;  %133 = vadd.xlane.f32.xlu1 %v112_v45  ;;  %135 = vadd.xlane.f32.xlu0 %v113_v49  ;;  %v937_v53 = vsub.f32 %v35_v9, %v84_v50 }
  0x9f   :  { %v63_v55 = vpop.xlane.xlu0 %62  ;;  %v65_v56 = vpop.xlane.xlu1 %64 }
  0xa0   :  { %v85_v57 = vmul.f32 0.0078125, %v63_v55  ;;  %v115_v58 = vmul.f32 %v935_v52, %v935_v52  ;;  %v86_v59 = vmul.f32 0.0078125, %v65_v56  ;;  %v116_v63 = vmul.f32 %v937_v53, %v937_v53 }
  0xa2   :  { %v947_v61 = vsub.f32 %v869_v10, %v85_v57  ;;  %137 = vadd.xlane.f32.xlu1 %v114_v54  ;;  %139 = vadd.xlane.f32.xlu0 %v115_v58  ;;  %v950_v62 = vsub.f32 %v874_v11, %v86_v59 }
  0xa3   :  { %v67_v0 = vpop.xlane.xlu0 %66  ;;  %v69_v1 = vpop.xlane.xlu1 %68 }
  0xa4   :  { %v87_v2 = vmul.f32 0.0078125, %v67_v0  ;;  %v117_v3 = vmul.f32 %v947_v61, %v947_v61  ;;  %v88_v4 = vmul.f32 0.0078125, %v69_v1  ;;  %v118_v8 = vmul.f32 %v950_v62, %v950_v62  ;;  %v1000_v1 = vld [vmem:[%s1170_s2] ss:$0 sm:$0xff] }
  0xa6   :  { %v960_v6 = vsub.f32 %v881_v12, %v87_v2  ;;  %141 = vadd.xlane.f32.xlu1 %v116_v63  ;;  %143 = vadd.xlane.f32.xlu0 %v117_v3  ;;  %v963_v7 = vsub.f32 %v886_v13, %v88_v4  ;;  %v718_v12 = vld [vmem:[%s1169_s4 + $0x20] sm:$0xff]  }
  0xa7   :  { %v71_v9 = vpop.xlane.xlu0 %70  ;;  %v73_v10 = vpop.xlane.xlu1 %72  ;;  %667 = vmatprep.subr.bf16.mxu0 %v718_v12 }
  0xa8   :  { %v89_v11 = vmul.f32 0.0078125, %v71_v9  ;;  %v119_v16 = vmul.f32 %v960_v6, %v960_v6  ;;  %v90_v17 = vmul.f32 0.0078125, %v73_v10  ;;  %v120_v19 = vmul.f32 %v963_v7, %v963_v7  ;;  %668 = vmatpush3.bf16.msra.mxu0 %v718_v12 }
  0xa9   :  { %669 = vmatprep.subr.bf16.mxu0 %v719_v23 }
  0xaa   :  { %v973_v18 = vsub.f32 %v893_v14, %v89_v11  ;;  %145 = vadd.xlane.f32.xlu1 %v118_v8  ;;  %147 = vadd.xlane.f32.xlu0 %v119_v16  ;;  %v976_v13 = vsub.f32 %v898_v15, %v90_v17  ;;  %v720_v15 = vld [vmem:[%s1169_s4 + $0x10] sm:$0xff]  }
  0xac   :  { %v121_v22 = vmul.f32 %v973_v18, %v973_v18  ;;  %v122_v14 = vmul.f32 %v976_v13, %v976_v13  ;;  %670 = vmatpush3.bf16.msra.mxu0 %v719_v23 }
  0xad   :  { %671 = vmatprep.subr.bf16.mxu0 %v720_v15 }
  0xae   :  { %149 = vadd.xlane.f32.xlu1 %v120_v19  ;;  %151 = vadd.xlane.f32.xlu0 %v121_v22 }
  0xb0   :  { %672 = vmatpush3.bf16.msra.mxu0 %v720_v15 }
  0xb1   :  { %673 = vmatprep.subr.bf16.mxu0 %v721_v24 }
  0xb2   :  { %153 = vadd.xlane.f32.xlu1 %v122_v14 }
  0xb4   :  { %674 = vmatpush3.bf16.msra.mxu0 %v721_v24 }
  0xb5   :  { %675 = vmatprep.subr.bf16.mxu0 %v722_v25 }
  0xb8   :  { %676 = vmatpush3.bf16.msra.mxu0 %v722_v25 }
 0x11b   :  { %v124_v26 = vpop.xlane.xlu0 %123 }
 0x11c   :  { %v155_v29 = vmul.f32 0.0078125, %v124_v26 }
 0x11e   :  { %v171_v30 = vadd.f32 1e-05, %v155_v29 }
 0x11f   :  { %v126_v31 = vpop.xlane.xlu1 %125  ;;  %v128_v32 = vpop.xlane.xlu0 %127 }
 0x120   :  { %723 = vrsqrt.f32 %v171_v30  ;;  %v156_v33 = vmul.f32 0.0078125, %v126_v31  ;;  %v157_v34 = vmul.f32 0.0078125, %v128_v32 }
 0x122   :  { %v172_v37 = vadd.f32 1e-05, %v156_v33  ;;  %v173_v38 = vadd.f32 1e-05, %v157_v34 }
 0x123   :  { %v130_v39 = vpop.xlane.xlu1 %129  ;;  %v132_v40 = vpop.xlane.xlu0 %131 }
 0x124   :  { %725 = vrsqrt.f32 %v172_v37  ;;  %v158_v41 = vmul.f32 0.0078125, %v130_v39  ;;  %v159_v42 = vmul.f32 0.0078125, %v132_v40 }
 0x125   :  { %727 = vrsqrt.f32 %v173_v38 }
 0x126   :  { %v174_v45 = vadd.f32 1e-05, %v158_v41  ;;  %v175_v46 = vadd.f32 1e-05, %v159_v42 }
 0x127   :  { %v134_v47 = vpop.xlane.xlu1 %133  ;;  %v136_v48 = vpop.xlane.xlu0 %135 }
 0x128   :  { %729 = vrsqrt.f32 %v174_v45  ;;  %v160_v49 = vmul.f32 0.0078125, %v134_v47  ;;  %v161_v50 = vmul.f32 0.0078125, %v136_v48 }
 0x129   :  { %731 = vrsqrt.f32 %v175_v46 }
 0x12a   :  { %v176_v51 = vadd.f32 1e-05, %v160_v49  ;;  %v177_v54 = vadd.f32 1e-05, %v161_v50 }
 0x12b   :  { %v138_v55 = vpop.xlane.xlu1 %137  ;;  %v140_v56 = vpop.xlane.xlu0 %139 }
 0x12c   :  { %733 = vrsqrt.f32 %v176_v51  ;;  %v162_v57 = vmul.f32 0.0078125, %v138_v55  ;;  %v163_v58 = vmul.f32 0.0078125, %v140_v56 }
 0x12d   :  { %v724_v59 = vpop.eup %723  ;;  %735 = vrsqrt.f32 %v177_v54 }
 0x12e   :  { %v178_v60 = vadd.f32 1e-05, %v162_v57  ;;  %v179_v63 = vadd.f32 1e-05, %v163_v58  ;;  %v203_v0 = vmul.f32 %v724_v59, %v902_v20  ;;  %v1007_v20 = vld [vmem:[%s1171_s3] ss:$0 sm:$0xff] }
 0x12f   :  { %v142_v2 = vpop.xlane.xlu1 %141  ;;  %v144_v3 = vpop.xlane.xlu0 %143 }
 0x130   :  { %737 = vrsqrt.f32 %v178_v60  ;;  %v164_v4 = vmul.f32 0.0078125, %v142_v2  ;;  %v165_v5 = vmul.f32 0.0078125, %v144_v3  ;;  %v226_v9 = vmul.f32 %v1000_v1, %v203_v0 }
 0x131   :  { %v726_v8 = vpop.eup %725  ;;  %739 = vrsqrt.f32 %v179_v63 }
 0x132   :  { %v728_v10 = vpop.eup %727  ;;  %v180_v11 = vadd.f32 1e-05, %v164_v4  ;;  %v181_v16 = vadd.f32 1e-05, %v165_v5  ;;  %v204_v17 = vmul.f32 %v726_v8, %v908_v27  ;;  %v249_v25 = vadd.f32 %v1007_v20, %v226_v9 }
 0x133   :  { %v146_v12 = vpop.xlane.xlu1 %145  ;;  %v148_v19 = vpop.xlane.xlu0 %147  ;;  %v205_v22 = vmul.f32 %v728_v10, %v904_v21 }
 0x134   :  { %741 = vrsqrt.f32 %v180_v11  ;;  %v166_v23 = vmul.f32 0.0078125, %v146_v12  ;;  %v167_v14 = vmul.f32 0.0078125, %v148_v19  ;;  %v227_v15 = vmul.f32 %v1000_v1, %v204_v17 }
 0x135   :  { %v730_v24 = vpop.eup %729  ;;  %743 = vrsqrt.f32 %v181_v16  ;;  %v228_v21 = vmul.f32 %v1000_v1, %v205_v22 }
 0x136   :  { %v732_v26 = vpop.eup %731  ;;  %v182_v27 = vadd.f32 1e-05, %v166_v23  ;;  %v183_v29 = vadd.f32 1e-05, %v167_v14  ;;  %v250_v30 = vadd.f32 %v1007_v20, %v227_v15  ;;  %v206_v31 = vmul.f32 %v730_v24, %v910_v28 }
 0x137   :  { %v150_v32 = vpop.xlane.xlu1 %149  ;;  %v152_v33 = vpop.xlane.xlu0 %151  ;;  %v207_v34 = vmul.f32 %v732_v26, %v916_v35  ;;  %v251_v49 = vadd.f32 %v1007_v20, %v228_v21 }
 0x138   :  { %745 = vrsqrt.f32 %v182_v27  ;;  %v168_v37 = vmul.f32 0.0078125, %v150_v32  ;;  %v169_v38 = vmul.f32 0.0078125, %v152_v33  ;;  %v265_v39 = vpack.c.bf16 %v250_v30, %v249_v25 }
 0x139   :  { %v734_v40 = vpop.eup %733  ;;  %747 = vrsqrt.f32 %v183_v29  ;;  %v229_v41 = vmul.f32 %v1000_v1, %v206_v31  ;;  %v230_v42 = vmul.f32 %v1000_v1, %v207_v34 }
 0x13a   :  { %v736_v45 = vpop.eup %735  ;;  %v184_v46 = vadd.f32 1e-05, %v168_v37  ;;  %v185_v47 = vadd.f32 1e-05, %v169_v38  ;;  %677 = vmatprep.mubr.bf16.mxu0 %v265_v39  ;;  %v208_v28 = vmul.f32 %v734_v40, %v918_v36 }
 0x13b   :  { %v154_v48 = vpop.xlane.xlu1 %153  ;;  %v252_v35 = vadd.f32 %v1007_v20, %v229_v41  ;;  %v209_v50 = vmul.f32 %v736_v45, %v924_v43  ;;  %v253_v57 = vadd.f32 %v1007_v20, %v230_v42 }
 0x13c   :  { %749 = vrsqrt.f32 %v184_v46  ;;  %v170_v51 = vmul.f32 0.0078125, %v154_v48  ;;  %v231_v54 = vmul.f32 %v1000_v1, %v208_v28 }
 0x13d   :  { %v738_v55 = vpop.eup %737  ;;  %751 = vrsqrt.f32 %v185_v47  ;;  %v266_v56 = vpack.c.bf16 %v252_v35, %v251_v49  ;;  %v232_v63 = vmul.f32 %v1000_v1, %v209_v50 }
 0x13e   :  { %v740_v58 = vpop.eup %739  ;;  %v186_v59 = vadd.f32 1e-05, %v170_v51  ;;  %v254_v36 = vadd.f32 %v1007_v20, %v231_v54  ;;  %v210_v60 = vmul.f32 %v738_v55, %v926_v44 }
 0x13f   :  { %678 = vmatmul.mubr.bf16.vlgmr.msra.gmra.mxu0 %v266_v56  ;;  %v211_v43 = vmul.f32 %v740_v58, %v935_v52  ;;  %v255_v5 = vadd.f32 %v1007_v20, %v232_v63 }
 0x140   :  { %753 = vrsqrt.f32 %v186_v59  ;;  %v267_v0 = vpack.c.bf16 %v254_v36, %v253_v57  ;;  %v233_v2 = vmul.f32 %v1000_v1, %v210_v60 }
 0x141   :  { %v742_v3 = vpop.eup %741  ;;  %v234_v44 = vmul.f32 %v1000_v1, %v211_v43 }
 0x142   :  { %v744_v4 = vpop.eup %743  ;;  %681 = vmatprep.mubr.bf16.mxu0 %v267_v0  ;;  %v256_v8 = vadd.f32 %v1007_v20, %v233_v2  ;;  %v212_v9 = vmul.f32 %v742_v3, %v937_v53 }
 0x143   :  { %v213_v10 = vmul.f32 %v744_v4, %v947_v61  ;;  %v257_v12 = vadd.f32 %v1007_v20, %v234_v44 }
 0x144   :  { %v268_v11 = vpack.c.bf16 %v256_v8, %v255_v5  ;;  %v235_v52 = vmul.f32 %v1000_v1, %v212_v9  ;;  %v1115_v5 = vld [vmem:[%s1172_s5] sm:$0xff] }
 0x145   :  { %v746_v16 = vpop.eup %745  ;;  %v236_v23 = vmul.f32 %v1000_v1, %v213_v10  ;;  %v436_v44 = vmul.f32 %v1115_v5, %v1115_v5  ;;  %v1126_v10 = vld [vmem:[%s1172_s5 + $0x8] sm:$0xff] }
 0x146   :  { %v748_v17 = vpop.eup %747  ;;  %v258_v19 = vadd.f32 %v1007_v20, %v235_v52  ;;  %v214_v22 = vmul.f32 %v746_v16, %v950_v62  ;;  %v437_v52 = vmul.f32 %v1126_v10, %v1126_v10  ;;  %v799_v16 = vmov 0.0  }
 0x147   :  { %682 = vmatmul.mubr.bf16.gmra.mxu0 %v268_v11  ;;  %v215_v53 = vmul.f32 %v748_v17, %v960_v6  ;;  %v259_v25 = vadd.f32 %v1007_v20, %v236_v23  ;;  %693 = vmatprep.subr.bf16.mxu1 %v799_v16 }
 0x148   :  { %v269_v14 = vpack.c.bf16 %v258_v19, %v257_v12  ;;  %v237_v15 = vmul.f32 %v1000_v1, %v214_v22  ;;  %709 = vmatprep.mubr.msk.bf16.mxu1 %vm800_vm0, %v799_v16 }
 0x149   :  { %v750_v61 = vpop.eup %749  ;;  %v238_v29 = vmul.f32 %v1000_v1, %v215_v53 }
 0x14a   :  { %v752_v24 = vpop.eup %751  ;;  %685 = vmatprep.mubr.bf16.mxu0 %v269_v14  ;;  %v260_v26 = vadd.f32 %v1007_v20, %v237_v15  ;;  %v216_v27 = vmul.f32 %v750_v61, %v963_v7 }
 0x14b   :  { %v217_v62 = vmul.f32 %v752_v24, %v973_v18  ;;  %v261_v32 = vadd.f32 %v1007_v20, %v238_v29 }
 0x14c   :  { %v270_v30 = vpack.c.bf16 %v260_v26, %v259_v25  ;;  %v239_v31 = vmul.f32 %v1000_v1, %v216_v27 }
 0x14d   :  { %v754_v6 = vpop.eup %753  ;;  %v240_v34 = vmul.f32 %v1000_v1, %v217_v62 }
 0x14e   :  { %v262_v33 = vadd.f32 %v1007_v20, %v239_v31  ;;  %v218_v21 = vmul.f32 %v754_v6, %v976_v13 }
 0x14f   :  { %686 = vmatmul.mubr.bf16.gmra.mxu0 %v270_v30  ;;  %v263_v38 = vadd.f32 %v1007_v20, %v240_v34 }
 0x150   :  { %v271_v37 = vpack.c.bf16 %v262_v33, %v261_v32  ;;  %v241_v7 = vmul.f32 %v1000_v1, %v218_v21 }
 0x152   :  { %689 = vmatprep.mubr.bf16.mxu0 %v271_v37  ;;  %v264_v18 = vadd.f32 %v1007_v20, %v241_v7 }
 0x154   :  { %v272_v39 = vpack.c.bf16 %v264_v18, %v263_v38 }
 0x157   :  { %690 = vmatmul.mubr.bf16.gmra.mxu0 %v272_v39 }
 0x1ff   :  { %v1054_v40 = vpop.f32.mrf.mxu0 }
 0x200   :  { %v450_v3 = vmul.f32 %v1054_v40, %v1054_v40 }
 0x201   :  { %v1056_v41 = vpop.f32.mrf.mxu0 }
 0x202   :  { %v448_v8 = vmul.f32 %v1056_v41, %v1056_v41 }
 0x203   :  { %v1058_v42 = vpop.f32.mrf.mxu0 }
 0x204   :  { %v451_v9 = vmul.f32 %v1058_v42, %v1058_v42 }
 0x205   :  { %v1060_v13 = vpop.f32.mrf.mxu0 }
 0x206   :  { %v449_v11 = vmul.f32 %v1060_v13, %v1060_v13 }
 0x207   :  { %v1062_v45 = vpop.f32.mrf.mxu0 }
 0x208   :  { %v454_v63 = vmul.f32 %v1062_v45, %v1062_v45 }
 0x209   :  { %v1064_v46 = vpop.f32.mrf.mxu0 }
 0x20a   :  { %v452_v0 = vmul.f32 %v1064_v46, %v1064_v46 }
 0x20b   :  { %v1066_v1 = vpop.f32.mrf.mxu0 }
 0x20c   :  { %v455_v2 = vmul.f32 %v1066_v1, %v1066_v1 }
 0x20d   :  { %v1068_v47 = vpop.f32.mrf.mxu0 }
 0x20e   :  { %v453_v4 = vmul.f32 %v1068_v47, %v1068_v47 }
 0x20f   :  { %v1070_v28 = vpop.f32.mrf.mxu0 }
 0x210   :  { %v458_v59 = vmul.f32 %v1070_v28, %v1070_v28 }
 0x211   :  { %v1072_v20 = vpop.f32.mrf.mxu0 }
 0x212   :  { %v456_v36 = vmul.f32 %v1072_v20, %v1072_v20 }
 0x213   :  { %v1074_v48 = vpop.f32.mrf.mxu0 }
 0x214   :  { %v459_v60 = vmul.f32 %v1074_v48, %v1074_v48 }
 0x215   :  { %v1076_v49 = vpop.f32.mrf.mxu0 }
 0x216   :  { %v457_v43 = vmul.f32 %v1076_v49, %v1076_v49 }
 0x217   :  { %v1078_v35 = vpop.f32.mrf.mxu0 }
 0x218   :  { %v462_v50 = vmul.f32 %v1078_v35, %v1078_v35 }
 0x219   :  { %v1082_v51 = vpop.f32.mrf.mxu0 }
 0x21a   :  { %492 = vadd.xlane.f32.xlu0 %v462_v50  ;;  %v460_v55 = vmul.f32 %v1082_v51, %v1082_v51 }
 0x21b   :  { %v1084_v54 = vpop.f32.mrf.mxu0 }
 0x21c   :  { %v463_v56 = vmul.f32 %v1084_v54, %v1084_v54 }
 0x21d   :  { %v1090_v57 = vpop.f32.mrf.mxu0 }
 0x21e   :  { %488 = vadd.xlane.f32.xlu0 %v460_v55  ;;  %494 = vadd.xlane.f32.xlu1 %v463_v56  ;;  %v461_v58 = vmul.f32 %v1090_v57, %v1090_v57 }
 0x222   :  { %484 = vadd.xlane.f32.xlu0 %v458_v59  ;;  %490 = vadd.xlane.f32.xlu1 %v461_v58 }
 0x226   :  { %480 = vadd.xlane.f32.xlu0 %v456_v36  ;;  %486 = vadd.xlane.f32.xlu1 %v459_v60 }
 0x22a   :  { %476 = vadd.xlane.f32.xlu0 %v454_v63  ;;  %482 = vadd.xlane.f32.xlu1 %v457_v43 }
 0x22e   :  { %472 = vadd.xlane.f32.xlu0 %v452_v0  ;;  %478 = vadd.xlane.f32.xlu1 %v455_v2 }
 0x232   :  { %468 = vadd.xlane.f32.xlu0 %v450_v3  ;;  %474 = vadd.xlane.f32.xlu1 %v453_v4 }
 0x236   :  { %464 = vadd.xlane.f32.xlu0 %v448_v8  ;;  %470 = vadd.xlane.f32.xlu1 %v451_v9 }
 0x23a   :  { %466 = vadd.xlane.f32.xlu1 %v449_v11  ;;  %438 = vadd.xlane.f32.xlu0 %v436_v44 }
 0x23e   :  { %440 = vadd.xlane.f32.xlu1 %v437_v52 }
 0x2a3   :  { %v493_v17 = vpop.xlane.xlu0 %492 }
 0x2a4   :  { %v510_v12 = vmax.f32 %v493_v17, 1e-12 }
 0x2a6   :  { %755 = vrsqrt.f32 %v510_v12 }
 0x2a7   :  { %v495_v19 = vpop.xlane.xlu1 %494  ;;  %v489_v23 = vpop.xlane.xlu0 %488 }
 0x2a8   :  { %v511_v22 = vmax.f32 %v495_v19, 1e-12  ;;  %v508_v15 = vmax.f32 %v489_v23, 1e-12 }
 0x2aa   :  { %757 = vrsqrt.f32 %v511_v22 }
 0x2ab   :  { %v491_v53 = vpop.xlane.xlu1 %490  ;;  %v485_v24 = vpop.xlane.xlu0 %484 }
 0x2ac   :  { %v509_v14 = vmax.f32 %v491_v53, 1e-12  ;;  %v506_v26 = vmax.f32 %v485_v24, 1e-12 }
 0x2ae   :  { %759 = vrsqrt.f32 %v509_v14 }
 0x2af   :  { %v487_v61 = vpop.xlane.xlu1 %486  ;;  %761 = vrsqrt.f32 %v508_v15  ;;  %v481_v6 = vpop.xlane.xlu0 %480 }
 0x2b0   :  { %v507_v25 = vmax.f32 %v487_v61, 1e-12  ;;  %v504_v34 = vmax.f32 %v481_v6, 1e-12 }
 0x2b2   :  { %763 = vrsqrt.f32 %v507_v25 }
 0x2b3   :  { %v756_v27 = vpop.eup %755  ;;  %v483_v62 = vpop.xlane.xlu1 %482  ;;  %765 = vrsqrt.f32 %v506_v26 }
 0x2b4   :  { %v542_v30 = vmul.f32 %v756_v27, %v1078_v35  ;;  %v505_v32 = vmax.f32 %v483_v62, 1e-12  ;;  %v477_v39 = vpop.xlane.xlu0 %476 }
 0x2b5   :  { %v502_v55 = vmax.f32 %v477_v39, 1e-12 }
 0x2b6   :  { %767 = vrsqrt.f32 %v505_v32 }
 0x2b7   :  { %v758_v29 = vpop.eup %757  ;;  %v479_v38 = vpop.xlane.xlu1 %478  ;;  %769 = vrsqrt.f32 %v504_v34 }
 0x2b8   :  { %v543_v31 = vmul.f32 %v758_v29, %v1084_v54  ;;  %v503_v35 = vmax.f32 %v479_v38, 1e-12  ;;  %v473_v36 = vpop.xlane.xlu0 %472 }
 0x2b9   :  { %v500_v43 = vmax.f32 %v473_v36, 1e-12 }
 0x2ba   :  { %v552_v33 = vpack.c.bf16 %v543_v31, %v542_v30  ;;  %771 = vrsqrt.f32 %v503_v35 }
 0x2bb   :  { %v760_v21 = vpop.eup %759  ;;  %v475_v59 = vpop.xlane.xlu1 %474  ;;  %773 = vrsqrt.f32 %v502_v55 }
 0x2bc   :  { %694 = vmatpush3.bf16.xpose.msra.mxu1 %v552_v33  ;;  %v762_v37 = vpop.eup %761  ;;  %v541_v7 = vmul.f32 %v760_v21, %v1090_v57  ;;  %v501_v60 = vmax.f32 %v475_v59, 1e-12  ;;  %v469_v4 = vpop.xlane.xlu0 %468 }
 0x2bd   :  { %695 = vmatprep.subr.bf16.mxu1 %v799_v16  ;;  %v540_v18 = vmul.f32 %v762_v37, %v1082_v51  ;;  %v498_v44 = vmax.f32 %v469_v4, 1e-12 }
 0x2be   :  { %775 = vrsqrt.f32 %v501_v60 }
 0x2bf   :  { %v551_v50 = vpack.c.bf16 %v541_v7, %v540_v18  ;;  %v764_v54 = vpop.eup %763  ;;  %v471_v3 = vpop.xlane.xlu1 %470  ;;  %777 = vrsqrt.f32 %v500_v43 }
 0x2c0   :  { %v766_v56 = vpop.eup %765  ;;  %v539_v58 = vmul.f32 %v764_v54, %v1074_v48  ;;  %v499_v8 = vmax.f32 %v471_v3, 1e-12  ;;  %v465_v17 = vpop.xlane.xlu0 %464 }
 0x2c1   :  { %v538_v57 = vmul.f32 %v766_v56, %v1070_v28  ;;  %v496_v53 = vmax.f32 %v465_v17, 1e-12 }
 0x2c2   :  { %779 = vrsqrt.f32 %v499_v8 }
 0x2c3   :  { %v550_v63 = vpack.c.bf16 %v539_v58, %v538_v57  ;;  %v768_v51 = vpop.eup %767  ;;  %v467_v12 = vpop.xlane.xlu1 %466  ;;  %781 = vrsqrt.f32 %v498_v44 }
 0x2c4   :  { %696 = vmatpush3.bf16.xpose.msra.mxu1 %v551_v50  ;;  %v770_v0 = vpop.eup %769  ;;  %v537_v2 = vmul.f32 %v768_v51, %v1076_v49  ;;  %v497_v19 = vmax.f32 %v467_v12, 1e-12  ;;  %v439_v23 = vpop.xlane.xlu0 %438 }
 0x2c5   :  { %697 = vmatprep.subr.bf16.mxu1 %v799_v16  ;;  %v536_v48 = vmul.f32 %v770_v0, %v1072_v20  ;;  %v442_v24 = vmax.f32 %v439_v23, 1e-12 }
 0x2c6   :  { %783 = vrsqrt.f32 %v497_v19 }
 0x2c7   :  { %v549_v9 = vpack.c.bf16 %v537_v2, %v536_v48  ;;  %v772_v28 = vpop.eup %771  ;;  %v441_v14 = vpop.xlane.xlu1 %440  ;;  %785 = vrsqrt.f32 %v496_v53 }
 0x2c8   :  { %v774_v11 = vpop.eup %773  ;;  %v535_v52 = vmul.f32 %v772_v28, %v1066_v1  ;;  %v443_v1 = vmax.f32 %v441_v14, 1e-12  ;;  %787 = vrsqrt.f32 %v442_v24 }
 0x2c9   :  { %v534_v49 = vmul.f32 %v774_v11, %v1062_v45 }
 0x2ca   :  { %789 = vrsqrt.f32 %v443_v1 }
 0x2cb   :  { %v548_v22 = vpack.c.bf16 %v535_v52, %v534_v49  ;;  %v776_v20 = vpop.eup %775 }
 0x2cc   :  { %698 = vmatpush3.bf16.xpose.msra.mxu1 %v550_v63  ;;  %v778_v15 = vpop.eup %777  ;;  %v533_v61 = vmul.f32 %v776_v20, %v1068_v47 }
 0x2cd   :  { %699 = vmatprep.subr.bf16.mxu1 %v799_v16  ;;  %v532_v25 = vmul.f32 %v778_v15, %v1064_v46 }
 0x2cf   :  { %v547_v26 = vpack.c.bf16 %v533_v61, %v532_v25  ;;  %v780_v45 = vpop.eup %779 }
 0x2d0   :  { %v782_v27 = vpop.eup %781  ;;  %v531_v29 = vmul.f32 %v780_v45, %v1058_v42 }
 0x2d1   :  { %v530_v62 = vmul.f32 %v782_v27, %v1054_v40  ;;  %v597_v40 = vlaneseq }
 0x2d3   :  { %v546_v30 = vpack.c.bf16 %v531_v29, %v530_v62  ;;  %v784_v31 = vpop.eup %783  ;;  %v598_v7 = vand.u32 127, %v597_v40 }
 0x2d4   :  { %700 = vmatpush3.bf16.xpose.msra.mxu1 %v549_v9  ;;  %v786_v47 = vpop.eup %785  ;;  %v529_v46 = vmul.f32 %v784_v31, %v1060_v13 }
 0x2d5   :  { %701 = vmatprep.subr.bf16.mxu1 %v799_v16  ;;  %v788_v6 = vpop.eup %787  ;;  %v528_v33 = vmul.f32 %v786_v47, %v1056_v41  ;;  %vm599_vm1 = vcmp.lt.s32.totalorder %v598_v7, 4 }
 0x2d6   :  { %v446_v34 = vmul.f32 %v788_v6, %v1115_v5 }
 0x2d7   :  { %v790_v32 = vpop.eup %789  ;;  %v545_v21 = vpack.c.bf16 %v529_v46, %v528_v33 }
 0x2d8   :  { %v447_v37 = vmul.f32 %v790_v32, %v1126_v10 }
 0x2da   :  { %v544_v42 = vpack.c.bf16 %v447_v37, %v446_v34 }
 0x2dc   :  { %702 = vmatpush3.bf16.xpose.msra.mxu1 %v548_v22 }
 0x2dd   :  { %703 = vmatprep.subr.bf16.mxu1 %v799_v16 }
 0x2e4   :  { %704 = vmatpush3.bf16.xpose.msra.mxu1 %v547_v26 }
 0x2e5   :  { %705 = vmatprep.subr.bf16.mxu1 %v799_v16 }
 0x2ec   :  { %706 = vmatpush3.bf16.xpose.msra.mxu1 %v546_v30 }
 0x2ed   :  { %707 = vmatprep.subr.bf16.mxu1 %v799_v16  ;;  %v594_v16 = vstv %s1173_s0 }
 0x2f4   :  { %708 = vmatpush3.bf16.xpose.msra.mxu1 %v545_v21 }
 0x2fb   :  { %710 = vmatmul.mubr.bf16.vlgmr.msra.gmra.mxu1 %v544_v42 }
 0x3bb   :  { %v587_v38 = vpop.f32.mrf.mxu1 }
 0x3bc   :  { %v595_v13 = vmul.f32 %v594_v16, %v587_v38 }
 0x3bd   :  { %v711_v18 = vpop.f32.mrf.mxu1 }
 0x3be   :  { %v600_v39 = vsel %vm599_vm1, %v595_v13, -inf }
 0x3bf   :  { %v590_v41 = vpop.f32.mrf.mxu1  ;;  %602 = vmax.xlane.f32.xlu0 %v600_v39 }
 0x3c0   :  { %v596_v35 = vmul.f32 %v594_v16, %v590_v41 }
 0x3c1   :  { %v712_v5 = vpop.f32.mrf.mxu1 }
 0x3c2   :  { %v601_v50 = vsel %vm599_vm1, %v596_v35, -inf }
 0x3c3   :  { %604 = vmax.xlane.f32.xlu1 %v601_v50 }
 0x448   :  { %v603_v10 = vpop.xlane.xlu0 %602 }
 0x449   :  { %v606_v54 = vsub.f32 %v600_v39, %v603_v10 }
 0x44b   :  { %v608_v55 = vmul.f32 1.442695, %v606_v54 }
 0x44c   :  { %v605_v56 = vpop.xlane.xlu1 %604 }
 0x44d   :  { %791 = vpow2.f32 %v608_v55  ;;  %v607_v58 = vsub.f32 %v601_v50, %v605_v56 }
 0x44f   :  { %v610_v59 = vmul.f32 1.442695, %v607_v58 }
 0x451   :  { %793 = vpow2.f32 %v610_v59 }
 0x45a   :  { %v792_v57 = vpop.eup %791 }
 0x45b   :  { %612 = vadd.xlane.f32.xlu0 %v792_v57 }
 0x45e   :  { %v794_v36 = vpop.eup %793 }
 0x45f   :  { %614 = vadd.xlane.f32.xlu1 %v794_v36 }
 0x4e4   :  { %v613_v60 = vpop.xlane.xlu0 %612 }
 0x4e5   :  { %795 = vrcp.f32 %v613_v60 }
 0x4e8   :  { %v615_v63 = vpop.xlane.xlu1 %614 }
 0x4e9   :  { %797 = vrcp.f32 %v615_v63 }
 0x4f2   :  { %v796_v51 = vpop.eup %795 }
 0x4f3   :  { %v618_v43 = vmul.f32 %v796_v51, %v792_v57 }
 0x4f5   :  { %620 = vst [vmem:[%s1174_s6] sm:$0xff] %v618_v43 }
 0x4f6   :  { %v798_v0 = vpop.eup %797 }
 0x4f7   :  { %v619_v2 = vmul.f32 %v798_v0, %v794_v36 }
 0x4f9   :  { %621 = vst [vmem:[%s1174_s6 + $0x8] sm:$0xff] %v619_v2 }

</bundles_post_ra>
